<compile_context>
chip_gen: v5e
topology: v5e:2x2
jax: 0.10.0
libtpu: 0.0.40
codegen_flags: <defaults>
</compile_context>

<pallas_src>
import functools

import jax
import jax.numpy as jnp
from jax import lax
from jax.experimental import pallas as pl
from jax.experimental.pallas import tpu as pltpu

BN_EPS = 1e-5
TM_PREF = 512                     # row tile
TN_PREF = 256                     # output-channel tile (multiple of 128)
VMEM_LIMIT = 32 * 1024 * 1024     # fits v5e/v6e/v7x scoped VMEM with headroom


# ---------------------------------------------------------------------------
# Small helpers
# ---------------------------------------------------------------------------
def _round_up(x, m):
    return (x + m - 1) // m * m


def _tile_and_pad(dim, pref, align):
    """Pick a tile size (multiple of `align`) and the padded dim it divides."""
    d = _round_up(dim, align)
    if d <= pref:
        return d, d
    for t in range(pref, pref // 2 - 1, -align):
        if d % t == 0:
            return t, d
    return pref, _round_up(d, pref)


def _pad2d(a, rows, cols):
    pr, pc = rows - a.shape[0], cols - a.shape[1]
    if pr or pc:
        a = jnp.pad(a, ((0, pr), (0, pc)))
    return a


# ---------------------------------------------------------------------------
# Pallas kernels
# ---------------------------------------------------------------------------
def _mm_stats_kernel(x_ref, w_ref, y_ref, s1_ref, s2_ref):
    """Full-K matmul for one (row, col) tile. Emits the pre-BN output in
    y_ref.dtype (bf16) and per-tile column sums / sums-of-squares taken from
    the fp32 accumulator (for the global BatchNorm batch statistics)."""
    acc = jnp.dot(x_ref[...], w_ref[...], preferred_element_type=jnp.float32)
    y_ref[...] = acc.astype(y_ref.dtype)
    s1_ref[...] = jnp.broadcast_to(
        jnp.sum(acc, axis=0, keepdims=True), s1_ref.shape)
    s2_ref[...] = jnp.broadcast_to(
        jnp.sum(acc * acc, axis=0, keepdims=True), s2_ref.shape)


def _mm_stats_fused_kernel(x_ref, sc_ref, sh_ref, w_ref, y_ref, s1_ref, s2_ref,
                           *, tm, m_valid):
    """Same as _mm_stats_kernel, but the x tile is the previous stage's
    pre-BN activation: apply BN affine + ReLU on the fly (VPU work hidden
    under the MXU).  Padded rows (if any) are masked to keep stats exact."""
    x = jnp.maximum(x_ref[...].astype(jnp.float32) * sc_ref[...] + sh_ref[...],
                    0.0)
    if m_valid is not None:
        rows = pl.program_id(1) * tm + lax.broadcasted_iota(
            jnp.int32, (tm, 1), 0)
        x = jnp.where(rows < m_valid, x, 0.0)
    acc = jnp.dot(x.astype(jnp.bfloat16), w_ref[...],
                  preferred_element_type=jnp.float32)
    y_ref[...] = acc.astype(y_ref.dtype)
    s1_ref[...] = jnp.broadcast_to(
        jnp.sum(acc, axis=0, keepdims=True), s1_ref.shape)
    s2_ref[...] = jnp.broadcast_to(
        jnp.sum(acc * acc, axis=0, keepdims=True), s2_ref.shape)


def _final_proj_kernel(y_ref, sc_ref, sh_ref, ys_ref, scs_ref, shs_ref, o_ref):
    """out = relu(bn3(y3) + bn_s(y_shortcut)) — all (M,C) streams bf16."""
    main = y_ref[...].astype(jnp.float32) * sc_ref[...] + sh_ref[...]
    res = ys_ref[...].astype(jnp.float32) * scs_ref[...] + shs_ref[...]
    o_ref[...] = jnp.maximum(main + res, 0.0).astype(o_ref.dtype)


def _final_identity_kernel(y_ref, sc_ref, sh_ref, r_ref, o_ref):
    """out = relu(bn3(y3) + x) — identity shortcut (bf16 residual)."""
    main = y_ref[...].astype(jnp.float32) * sc_ref[...] + sh_ref[...]
    o_ref[...] = jnp.maximum(main + r_ref[...].astype(jnp.float32),
                             0.0).astype(o_ref.dtype)


# ---------------------------------------------------------------------------
# Pallas wrappers
# ---------------------------------------------------------------------------
def _matmul_bn_stats(xp, wp, *, tm, tn, in_scale=None, in_shift=None,
                     m_valid=None):
    """xp: padded (Mp, Kp) bf16 (pre-BN if in_scale/in_shift given),
    wp: padded (Kp, Np) bf16.  Returns (y_bf16 (Mp,Np), s1, s2, gm)."""
    Mp, Kp = xp.shape
    Kpw, Np = wp.shape
    assert Kpw == Kp
    gm, gn = Mp // tm, Np // tn

    if in_scale is None:
        kernel = _mm_stats_kernel
        args = (xp, wp)
        in_specs = [
            pl.BlockSpec((tm, Kp), lambda j, i: (i, 0)),
            pl.BlockSpec((Kp, tn), lambda j, i: (0, j)),   # resident across i
        ]
    else:
        mask = m_valid if (m_valid is not None and Mp > m_valid) else None
        kernel = functools.partial(_mm_stats_fused_kernel, tm=tm, m_valid=mask)
        args = (xp, in_scale, in_shift, wp)
        in_specs = [
            pl.BlockSpec((tm, Kp), lambda j, i: (i, 0)),
            pl.BlockSpec((1, Kp), lambda j, i: (0, 0)),    # VMEM resident
            pl.BlockSpec((1, Kp), lambda j, i: (0, 0)),
            pl.BlockSpec((Kp, tn), lambda j, i: (0, j)),   # resident across i
        ]

    y, s1, s2 = pl.pallas_call(
        kernel,
        grid=(gn, gm),            # row axis innermost -> weight strip reused
        in_specs=in_specs,
        out_specs=(
            pl.BlockSpec((tm, tn), lambda j, i: (i, j)),
            pl.BlockSpec((8, tn), lambda j, i: (i, j)),
            pl.BlockSpec((8, tn), lambda j, i: (i, j)),
        ),
        out_shape=(
            jax.ShapeDtypeStruct((Mp, Np), jnp.bfloat16),
            jax.ShapeDtypeStruct((gm * 8, Np), jnp.float32),
            jax.ShapeDtypeStruct((gm * 8, Np), jnp.float32),
        ),
        compiler_params=pltpu.CompilerParams(
            dimension_semantics=("parallel", "parallel"),
            vmem_limit_bytes=VMEM_LIMIT),
    )(*args)
    return y, s1, s2, gm


def _bn_coeffs(s1, s2, gamma, beta, m_rows, c, n_pad, gm):
    """Tiny global reduce over per-tile partial sums -> BN scale/shift (fp32).
    Zero-padded rows/cols contribute 0, so divide by the true row count."""
    psum = s1.reshape(gm, 8, n_pad)[:, 0, :].sum(axis=0)
    psq = s2.reshape(gm, 8, n_pad)[:, 0, :].sum(axis=0)
    cnt = jnp.float32(m_rows)
    mean = psum / cnt
    var = jnp.maximum(psq / cnt - mean * mean, 0.0)   # guard fp cancellation
    inv = lax.rsqrt(var + BN_EPS)
    g = jnp.pad(gamma.astype(jnp.float32), (0, n_pad - c), constant_values=1.0)
    b = jnp.pad(beta.astype(jnp.float32), (0, n_pad - c))
    scale = (g * inv).reshape(1, n_pad)
    shift = (b - mean * g * inv).reshape(1, n_pad)
    return scale, shift


def _final_pass(y, scale, shift, *, tm, tn, res, res_scale=None,
                res_shift=None):
    """Fused bn3 + (projection-BN | identity) residual + ReLU, fp32 output."""
    Mp, Np = y.shape
    gm, gn = Mp // tm, Np // tn

    def tile_spec():
        return pl.BlockSpec((tm, tn), lambda i, j: (i, j))

    def vec_spec():
        return pl.BlockSpec((1, tn), lambda i, j: (0, j))

    if res_scale is not None:
        kernel = _final_proj_kernel
        args = (y, scale, shift, res, res_scale, res_shift)
        in_specs = [tile_spec(), vec_spec(), vec_spec(),
                    tile_spec(), vec_spec(), vec_spec()]
    else:
        kernel = _final_identity_kernel
        args = (y, scale, shift, res)
        in_specs = [tile_spec(), vec_spec(), vec_spec(), tile_spec()]

    return pl.pallas_call(
        kernel,
        grid=(gm, gn),
        in_specs=in_specs,
        out_specs=pl.BlockSpec((tm, tn), lambda i, j: (i, j)),
        out_shape=jax.ShapeDtypeStruct((Mp, Np), jnp.float32),
        compiler_params=pltpu.CompilerParams(
            dimension_semantics=("parallel", "parallel"),
            vmem_limit_bytes=VMEM_LIMIT),
    )(*args)


# ---------------------------------------------------------------------------
# Glue: im2col for the 3x3 conv (padding=1, stride s), NHWC, dtype-preserving
# ---------------------------------------------------------------------------
def im2col_3x3(x_nhwc, stride):
    # TODO(synk): stream the 9 taps through a grid axis / shifted-window
    # BlockSpecs inside the conv2 matmul instead of materializing patches.
    N, H, W, C = x_nhwc.shape
    xp = jnp.pad(x_nhwc, ((0, 0), (1, 1), (1, 1), (0, 0)))
    Ho = (H + 2 - 3) // stride + 1
    Wo = (W + 2 - 3) // stride + 1
    cols = []
    for dh in range(3):
        for dw in range(3):
            cols.append(
                xp[:, dh:dh + (Ho - 1) * stride + 1:stride,
                      dw:dw + (Wo - 1) * stride + 1:stride, :])
    patches = jnp.concatenate(cols, axis=-1)          # (N, Ho, Wo, 9*C)
    return patches.reshape(N * Ho * Wo, 9 * C), (Ho, Wo)


# ---------------------------------------------------------------------------
# Bottleneck module (parameters held as jnp arrays)
# ---------------------------------------------------------------------------
class BottleneckPallas:
    expansion = 4

    def __init__(self, in_planes, planes, stride=1, key=None):
        self.in_planes = in_planes
        self.planes = planes
        self.stride = stride
        out_planes = self.expansion * planes
        self.has_proj_shortcut = (stride != 1) or (in_planes != out_planes)

        key = jax.random.PRNGKey(42) if key is None else key
        k1, k2, k3, k4 = jax.random.split(key, 4)

        def conv_w(k, shape):   # PyTorch conv weight layout (Cout, Cin, kh, kw)
            return 0.1 * jax.random.normal(k, shape, dtype=jnp.float32)

        self.w1 = conv_w(k1, (planes, in_planes, 1, 1))
        self.w2 = conv_w(k2, (planes, planes, 3, 3))
        self.w3 = conv_w(k3, (out_planes, planes, 1, 1))
        self.g1 = jnp.ones((planes,), jnp.float32)
        self.b1 = jnp.zeros((planes,), jnp.float32)
        self.g2 = jnp.ones((planes,), jnp.float32)
        self.b2 = jnp.zeros((planes,), jnp.float32)
        self.g3 = jnp.ones((out_planes,), jnp.float32)
        self.b3 = jnp.zeros((out_planes,), jnp.float32)
        if self.has_proj_shortcut:
            self.ws = conv_w(k4, (out_planes, in_planes, 1, 1))
            self.gs = jnp.ones((out_planes,), jnp.float32)
            self.bs = jnp.zeros((out_planes,), jnp.float32)

    def __call__(self, x_nchw):
        P, s, Cin = self.planes, self.stride, self.in_planes
        Cout = self.expansion * P

        x = jnp.transpose(x_nchw, (0, 2, 3, 1)).astype(jnp.float32)   # NHWC
        N, H, W, _ = x.shape
        M1 = N * H * W
        Ho = (H + 2 - 3) // s + 1
        Wo = (W + 2 - 3) // s + 1
        M2 = N * Ho * Wo

        tm1, Mp1 = _tile_and_pad(M1, TM_PREF, 16)
        tm2, Mp2 = _tile_and_pad(M2, TM_PREF, 16)
        tn_mid, Np_mid = _tile_and_pad(P, TN_PREF, 128)
        tn_out, Np_out = _tile_and_pad(Cout, TN_PREF, 128)

        # ---- conv1 (1x1): matmul + BN stats (pre-BN y1 kept in bf16) -------
        Kp1 = _round_up(Cin, 128)
        xq1 = _pad2d(x.reshape(M1, Cin), Mp1, Kp1).astype(jnp.bfloat16)
        w1m = _pad2d(self.w1[:, :, 0, 0].T.astype(jnp.float32),
                     Kp1, Np_mid).astype(jnp.bfloat16)
        y1, s1a, s1b, gm1 = _matmul_bn_stats(xq1, w1m, tm=tm1, tn=tn_mid)
        sc1, sh1 = _bn_coeffs(s1a, s1b, self.g1, self.b1, M1, P, Np_mid, gm1)

        # ---- bn1 + relu folded into im2col construction (XLA fuses the
        #      elementwise with the pad/concat; the spatial zero pad must be
        #      applied AFTER the affine, so it cannot ride inside conv2). ----
        a1 = jnp.maximum(
            y1[:M1, :P].astype(jnp.float32) * sc1[:, :P] + sh1[:, :P],
            0.0).astype(jnp.bfloat16).reshape(N, H, W, P)
        patches, _ = im2col_3x3(a1, s)                     # (M2, 9P), bf16

        # ---- conv2 (3x3, stride s): matmul + BN stats -----------------------
        K2 = 9 * P
        Kp2 = _round_up(K2, 128)
        xq2 = _pad2d(patches, Mp2, Kp2)
        w2m = jnp.transpose(self.w2, (2, 3, 1, 0)).reshape(K2, P)
        w2m = _pad2d(w2m.astype(jnp.float32), Kp2, Np_mid).astype(jnp.bfloat16)
        y2, s2a, s2b, gm2 = _matmul_bn_stats(xq2, w2m, tm=tm2, tn=tn_mid)
        sc2, sh2 = _bn_coeffs(s2a, s2b, self.g2, self.b2, M2, P, Np_mid, gm2)

        # ---- conv3 (1x1) with bn2 + relu fused into the x-load; the padded
        #      bf16 y2 is carried straight in (no unpad/re-pad round trip). ---
        w3m = _pad2d(self.w3[:, :, 0, 0].T.astype(jnp.float32),
                     Np_mid, Np_out).astype(jnp.bfloat16)
        y3, s3a, s3b, gm3 = _matmul_bn_stats(
            y2, w3m, tm=tm2, tn=tn_out, in_scale=sc2, in_shift=sh2, m_valid=M2)
        sc3, sh3 = _bn_coeffs(s3a, s3b, self.g3, self.b3, M2, Cout, Np_out, gm3)

        # ---- shortcut + final fused bn3 / residual / relu pass --------------
        if self.has_proj_shortcut:
            Kps = _round_up(Cin, 128)
            xs = x[:, ::s, ::s, :].reshape(M2, Cin)
            xqs = _pad2d(xs, Mp2, Kps).astype(jnp.bfloat16)
            wsm = _pad2d(self.ws[:, :, 0, 0].T.astype(jnp.float32),
                         Kps, Np_out).astype(jnp.bfloat16)
            ys, ssa, ssb, gms = _matmul_bn_stats(xqs, wsm, tm=tm2, tn=tn_out)
            scs, shs = _bn_coeffs(ssa, ssb, self.gs, self.bs, M2, Cout,
                                  Np_out, gms)
            out = _final_pass(y3, sc3, sh3, tm=tm2, tn=tn_out,
                              res=ys, res_scale=scs, res_shift=shs)
        else:
            res = _pad2d(x.reshape(M1, Cin), Mp2, Np_out).astype(jnp.bfloat16)
            out = _final_pass(y3, sc3, sh3, tm=tm2, tn=tn_out, res=res)

        out = out[:M2, :Cout].reshape(N, Ho, Wo, Cout)
        return jnp.transpose(out, (0, 3, 1, 2))            # back to NCHW


# ---------------------------------------------------------------------------
# Pure-JAX fp32 reference (PyTorch semantics) for a tolerance check
# ---------------------------------------------------------------------------
def _ref_forward(block, x_nchw):
    def conv(x, w_oihw, stride, padding):
        w = jnp.transpose(w_oihw, (2, 3, 1, 0))             # HWIO
        return lax.conv_general_dilated(
            x, w, (stride, stride), padding,
            dimension_numbers=("NHWC", "HWIO", "NHWC"))

    def bn(y, gamma, beta):
        mean = jnp.mean(y, axis=(0, 1, 2))
        var = jnp.mean((y - mean) ** 2, axis=(0, 1, 2))      # biased
        return gamma * (y - mean) * lax.rsqrt(var + BN_EPS) + beta

    x = jnp.transpose(x_nchw, (0, 2, 3, 1)).astype(jnp.float32)
    o = jax.nn.relu(bn(conv(x, block.w1, 1, "VALID"), block.g1, block.b1))
    o = jax.nn.relu(bn(conv(o, block.w2, block.stride, ((1, 1), (1, 1))),
                       block.g2, block.b2))
    o = bn(conv(o, block.w3, 1, "VALID"), block.g3, block.b3)
    if block.has_proj_shortcut:
        sc = bn(conv(x, block.ws, block.stride, "VALID"), block.gs, block.bs)
    else:
        sc = x
    return jnp.transpose(jax.nn.relu(o + sc), (0, 3, 1, 2))


# ---------------------------------------------------------------------------
if __name__ == "__main__":
    key = jax.random.PRNGKey(0)
    kx, kp = jax.random.split(key)

    in_planes, planes, stride = 4, 4, 1
    x = jax.random.normal(kx, (2, in_planes, 16, 16), dtype=jnp.float32)  # NCHW

    block = BottleneckPallas(in_planes, planes, stride=stride, key=kp)
    fwd = jax.jit(block.__call__)
    y = jax.block_until_ready(fwd(x))

    assert y.shape == (2, BottleneckPallas.expansion * planes, 16, 16), y.shape
    assert bool(jnp.all(jnp.isfinite(y)))

    # Loose tolerance: matmul operands / inter-stage activations are bf16.
    y_ref = _ref_forward(block, x)
    err = float(jnp.max(jnp.abs(y - y_ref)))
    assert err < 0.3, f"max abs err vs fp32 reference: {err}"

    print("KERNEL_OK")
</pallas_src>

<mosaic_0001>
module attributes {stable_mosaic.version = 11 : i64} {
  func.func @_mm_stats_kernel(%arg0: i32, %arg1: i32, %arg2: memref<512x128xbf16, #tpu.memory_space<vmem>>, %arg3: memref<128x128xbf16, #tpu.memory_space<vmem>>, %arg4: memref<512x128xbf16, #tpu.memory_space<vmem>>, %arg5: memref<8x128xf32, #tpu.memory_space<vmem>>, %arg6: memref<8x128xf32, #tpu.memory_space<vmem>>) attributes {dimension_semantics = [#tpu.dimension_semantics<parallel>, #tpu.dimension_semantics<parallel>], iteration_bounds = array<i64: 1, 1>, scalar_prefetch = 0 : i64, scratch_operands = 0 : i64, tpu.core_type = #tpu.core_type<tc>, window_params = [{transform_indices = @transform_0, window_bounds = array<i64: 512, 128>}, {transform_indices = @transform_1, window_bounds = array<i64: 128, 128>}, {transform_indices = @transform_2, window_bounds = array<i64: 512, 128>}, {transform_indices = @transform_3, window_bounds = array<i64: 8, 128>}, {transform_indices = @transform_4, window_bounds = array<i64: 8, 128>}]} {
    %c0 = arith.constant 0 : index
    %c0_0 = arith.constant 0 : index
    %0 = vector.load %arg2[%c0, %c0_0] : memref<512x128xbf16, #tpu.memory_space<vmem>>, vector<512x128xbf16>
    %c0_1 = arith.constant 0 : index
    %c0_2 = arith.constant 0 : index
    %1 = vector.load %arg3[%c0_1, %c0_2] : memref<128x128xbf16, #tpu.memory_space<vmem>>, vector<128x128xbf16>
    %cst = arith.constant dense<0.000000e+00> : vector<512x128xf32>
    %2 = tpu.matmul %0, %1, %cst {dimension_numbers = #tpu.dot_dimension_numbers<[1], [0], [0], [1], [0, 0, 1, 1], [], []>} : vector<512x128xbf16>, vector<128x128xbf16>, vector<512x128xf32> -> vector<512x128xf32>
    %3 = arith.truncf %2 : vector<512x128xf32> to vector<512x128xbf16>
    %c0_3 = arith.constant 0 : index
    %c0_4 = arith.constant 0 : index
    %4 = vector.load %arg4[%c0_3, %c0_4] : memref<512x128xbf16, #tpu.memory_space<vmem>>, vector<512x128xbf16>
    tpu.vector_store %arg4[%c0_3, %c0_4], %3 {strides = array<i32>} : memref<512x128xbf16, #tpu.memory_space<vmem>>, vector<512x128xbf16>,
    %cst_5 = arith.constant dense<0.000000e+00> : vector<128xf32>
    %5 = vector.multi_reduction <add>, %2, %cst_5 [0] : vector<512x128xf32> to vector<128xf32>
    %6 = vector.shape_cast %5 : vector<128xf32> to vector<1x128xf32>
    %7 = vector.shape_cast %6 : vector<1x128xf32> to vector<1x128xf32>
    %8 = vector.broadcast %7 : vector<1x128xf32> to vector<8x128xf32>
    %c0_6 = arith.constant 0 : index
    %c0_7 = arith.constant 0 : index
    %9 = vector.load %arg5[%c0_6, %c0_7] : memref<8x128xf32, #tpu.memory_space<vmem>>, vector<8x128xf32>
    tpu.vector_store %arg5[%c0_6, %c0_7], %8 {strides = array<i32>} : memref<8x128xf32, #tpu.memory_space<vmem>>, vector<8x128xf32>,
    %10 = arith.mulf %2, %2 : vector<512x128xf32>
    %cst_8 = arith.constant dense<0.000000e+00> : vector<128xf32>
    %11 = vector.multi_reduction <add>, %10, %cst_8 [0] : vector<512x128xf32> to vector<128xf32>
    %12 = vector.shape_cast %11 : vector<128xf32> to vector<1x128xf32>
    %13 = vector.shape_cast %12 : vector<1x128xf32> to vector<1x128xf32>
    %14 = vector.broadcast %13 : vector<1x128xf32> to vector<8x128xf32>
    %c0_9 = arith.constant 0 : index
    %c0_10 = arith.constant 0 : index
    %15 = vector.load %arg6[%c0_9, %c0_10] : memref<8x128xf32, #tpu.memory_space<vmem>>, vector<8x128xf32>
    tpu.vector_store %arg6[%c0_9, %c0_10], %14 {strides = array<i32>} : memref<8x128xf32, #tpu.memory_space<vmem>>, vector<8x128xf32>,
    return
  }
  func.func @transform_0(%arg0: i32, %arg1: i32) -> (i32, i32) {
    %c0_i32 = arith.constant 0 : i32
    %c0_i32_0 = arith.constant 0 : i32
    return %arg1, %c0_i32 : i32, i32
  }
  func.func @transform_1(%arg0: i32, %arg1: i32) -> (i32, i32) {
    %c0_i32 = arith.constant 0 : i32
    %c0_i32_0 = arith.constant 0 : i32
    return %c0_i32, %arg0 : i32, i32
  }
  func.func @transform_2(%arg0: i32, %arg1: i32) -> (i32, i32) {
    %c0_i32 = arith.constant 0 : i32
    return %arg1, %arg0 : i32, i32
  }
  func.func @transform_3(%arg0: i32, %arg1: i32) -> (i32, i32) {
    %c0_i32 = arith.constant 0 : i32
    return %arg1, %arg0 : i32, i32
  }
  func.func @transform_4(%arg0: i32, %arg1: i32) -> (i32, i32) {
    %c0_i32 = arith.constant 0 : i32
    return %arg1, %arg0 : i32, i32
  }
}

module attributes {stable_mosaic.version = 11 : i64} {
  func.func @_mm_stats_fused_kernel(%arg0: i32, %arg1: i32, %arg2: memref<512x128xbf16, #tpu.memory_space<vmem>>, %arg3: memref<1x128xf32, #tpu.memory_space<vmem>>, %arg4: memref<1x128xf32, #tpu.memory_space<vmem>>, %arg5: memref<128x128xbf16, #tpu.memory_space<vmem>>, %arg6: memref<512x128xbf16, #tpu.memory_space<vmem>>, %arg7: memref<8x128xf32, #tpu.memory_space<vmem>>, %arg8: memref<8x128xf32, #tpu.memory_space<vmem>>) attributes {dimension_semantics = [#tpu.dimension_semantics<parallel>, #tpu.dimension_semantics<parallel>], iteration_bounds = array<i64: 1, 1>, scalar_prefetch = 0 : i64, scratch_operands = 0 : i64, tpu.core_type = #tpu.core_type<tc>, window_params = [{transform_indices = @transform_0, window_bounds = array<i64: 512, 128>}, {pipeline_mode = #tpu.pipeline_mode<synchronous>, transform_indices = @transform_1, window_bounds = array<i64: 1, 128>}, {pipeline_mode = #tpu.pipeline_mode<synchronous>, transform_indices = @transform_2, window_bounds = array<i64: 1, 128>}, {transform_indices = @transform_3, window_bounds = array<i64: 128, 128>}, {transform_indices = @transform_4, window_bounds = array<i64: 512, 128>}, {transform_indices = @transform_5, window_bounds = array<i64: 8, 128>}, {transform_indices = @transform_6, window_bounds = array<i64: 8, 128>}]} {
    %c0 = arith.constant 0 : index
    %c0_0 = arith.constant 0 : index
    %0 = vector.load %arg2[%c0, %c0_0] : memref<512x128xbf16, #tpu.memory_space<vmem>>, vector<512x128xbf16>
    %1 = arith.extf %0 : vector<512x128xbf16> to vector<512x128xf32>
    %c0_1 = arith.constant 0 : index
    %c0_2 = arith.constant 0 : index
    %2 = vector.load %arg3[%c0_1, %c0_2] : memref<1x128xf32, #tpu.memory_space<vmem>>, vector<1x128xf32>
    %3 = vector.broadcast %2 : vector<1x128xf32> to vector<512x128xf32>
    %4 = arith.mulf %1, %3 : vector<512x128xf32>
    %c0_3 = arith.constant 0 : index
    %c0_4 = arith.constant 0 : index
    %5 = vector.load %arg4[%c0_3, %c0_4] : memref<1x128xf32, #tpu.memory_space<vmem>>, vector<1x128xf32>
    %6 = vector.broadcast %5 : vector<1x128xf32> to vector<512x128xf32>
    %7 = arith.addf %4, %6 : vector<512x128xf32>
    %cst = arith.constant 0.000000e+00 : f32
    %8 = vector.broadcast %cst : f32 to vector<512x128xf32>
    %9 = arith.maximumf %7, %8 : vector<512x128xf32>
    %10 = arith.truncf %9 : vector<512x128xf32> to vector<512x128xbf16>
    %c0_5 = arith.constant 0 : index
    %c0_6 = arith.constant 0 : index
    %11 = vector.load %arg5[%c0_5, %c0_6] : memref<128x128xbf16, #tpu.memory_space<vmem>>, vector<128x128xbf16>
    %cst_7 = arith.constant dense<0.000000e+00> : vector<512x128xf32>
    %12 = tpu.matmul %10, %11, %cst_7 {dimension_numbers = #tpu.dot_dimension_numbers<[1], [0], [0], [1], [0, 0, 1, 1], [], []>} : vector<512x128xbf16>, vector<128x128xbf16>, vector<512x128xf32> -> vector<512x128xf32>
    %13 = arith.truncf %12 : vector<512x128xf32> to vector<512x128xbf16>
    %c0_8 = arith.constant 0 : index
    %c0_9 = arith.constant 0 : index
    %14 = vector.load %arg6[%c0_8, %c0_9] : memref<512x128xbf16, #tpu.memory_space<vmem>>, vector<512x128xbf16>
    tpu.vector_store %arg6[%c0_8, %c0_9], %13 {strides = array<i32>} : memref<512x128xbf16, #tpu.memory_space<vmem>>, vector<512x128xbf16>,
    %cst_10 = arith.constant dense<0.000000e+00> : vector<128xf32>
    %15 = vector.multi_reduction <add>, %12, %cst_10 [0] : vector<512x128xf32> to vector<128xf32>
    %16 = vector.shape_cast %15 : vector<128xf32> to vector<1x128xf32>
    %17 = vector.shape_cast %16 : vector<1x128xf32> to vector<1x128xf32>
    %18 = vector.broadcast %17 : vector<1x128xf32> to vector<8x128xf32>
    %c0_11 = arith.constant 0 : index
    %c0_12 = arith.constant 0 : index
    %19 = vector.load %arg7[%c0_11, %c0_12] : memref<8x128xf32, #tpu.memory_space<vmem>>, vector<8x128xf32>
    tpu.vector_store %arg7[%c0_11, %c0_12], %18 {strides = array<i32>} : memref<8x128xf32, #tpu.memory_space<vmem>>, vector<8x128xf32>,
    %20 = arith.mulf %12, %12 : vector<512x128xf32>
    %cst_13 = arith.constant dense<0.000000e+00> : vector<128xf32>
    %21 = vector.multi_reduction <add>, %20, %cst_13 [0] : vector<512x128xf32> to vector<128xf32>
    %22 = vector.shape_cast %21 : vector<128xf32> to vector<1x128xf32>
    %23 = vector.shape_cast %22 : vector<1x128xf32> to vector<1x128xf32>
    %24 = vector.broadcast %23 : vector<1x128xf32> to vector<8x128xf32>
    %c0_14 = arith.constant 0 : index
    %c0_15 = arith.constant 0 : index
    %25 = vector.load %arg8[%c0_14, %c0_15] : memref<8x128xf32, #tpu.memory_space<vmem>>, vector<8x128xf32>
    tpu.vector_store %arg8[%c0_14, %c0_15], %24 {strides = array<i32>} : memref<8x128xf32, #tpu.memory_space<vmem>>, vector<8x128xf32>,
    return
  }
  func.func @transform_0(%arg0: i32, %arg1: i32) -> (i32, i32) {
    %c0_i32 = arith.constant 0 : i32
    %c0_i32_0 = arith.constant 0 : i32
    return %arg1, %c0_i32 : i32, i32
  }
  func.func @transform_1(%arg0: i32, %arg1: i32) -> (i32, i32) {
    %c0_i32 = arith.constant 0 : i32
    %c0_i32_0 = arith.constant 0 : i32
    %c0_i32_1 = arith.constant 0 : i32
    return %c0_i32, %c0_i32_0 : i32, i32
  }
  func.func @transform_2(%arg0: i32, %arg1: i32) -> (i32, i32) {
    %c0_i32 = arith.constant 0 : i32
    %c0_i32_0 = arith.constant 0 : i32
    %c0_i32_1 = arith.constant 0 : i32
    return %c0_i32, %c0_i32_0 : i32, i32
  }
  func.func @transform_3(%arg0: i32, %arg1: i32) -> (i32, i32) {
    %c0_i32 = arith.constant 0 : i32
    %c0_i32_0 = arith.constant 0 : i32
    return %c0_i32, %arg0 : i32, i32
  }
  func.func @transform_4(%arg0: i32, %arg1: i32) -> (i32, i32) {
    %c0_i32 = arith.constant 0 : i32
    return %arg1, %arg0 : i32, i32
  }
  func.func @transform_5(%arg0: i32, %arg1: i32) -> (i32, i32) {
    %c0_i32 = arith.constant 0 : i32
    return %arg1, %arg0 : i32, i32
  }
  func.func @transform_6(%arg0: i32, %arg1: i32) -> (i32, i32) {
    %c0_i32 = arith.constant 0 : i32
    return %arg1, %arg0 : i32, i32
  }
}

module attributes {stable_mosaic.version = 11 : i64} {
  func.func @_final_proj_kernel(%arg0: i32, %arg1: i32, %arg2: memref<512x128xbf16, #tpu.memory_space<vmem>>, %arg3: memref<1x128xf32, #tpu.memory_space<vmem>>, %arg4: memref<1x128xf32, #tpu.memory_space<vmem>>, %arg5: memref<512x128xbf16, #tpu.memory_space<vmem>>, %arg6: memref<1x128xf32, #tpu.memory_space<vmem>>, %arg7: memref<1x128xf32, #tpu.memory_space<vmem>>, %arg8: memref<512x128xf32, #tpu.memory_space<vmem>>) attributes {dimension_semantics = [#tpu.dimension_semantics<parallel>, #tpu.dimension_semantics<parallel>], iteration_bounds = array<i64: 1, 1>, scalar_prefetch = 0 : i64, scratch_operands = 0 : i64, tpu.core_type = #tpu.core_type<tc>, window_params = [{transform_indices = @transform_0, window_bounds = array<i64: 512, 128>}, {transform_indices = @transform_1, window_bounds = array<i64: 1, 128>}, {transform_indices = @transform_2, window_bounds = array<i64: 1, 128>}, {transform_indices = @transform_3, window_bounds = array<i64: 512, 128>}, {transform_indices = @transform_4, window_bounds = array<i64: 1, 128>}, {transform_indices = @transform_5, window_bounds = array<i64: 1, 128>}, {transform_indices = @transform_6, window_bounds = array<i64: 512, 128>}]} {
    %c0 = arith.constant 0 : index
    %c0_0 = arith.constant 0 : index
    %0 = vector.load %arg2[%c0, %c0_0] : memref<512x128xbf16, #tpu.memory_space<vmem>>, vector<512x128xbf16>
    %1 = arith.extf %0 : vector<512x128xbf16> to vector<512x128xf32>
    %c0_1 = arith.constant 0 : index
    %c0_2 = arith.constant 0 : index
    %2 = vector.load %arg3[%c0_1, %c0_2] : memref<1x128xf32, #tpu.memory_space<vmem>>, vector<1x128xf32>
    %3 = vector.broadcast %2 : vector<1x128xf32> to vector<512x128xf32>
    %4 = arith.mulf %1, %3 : vector<512x128xf32>
    %c0_3 = arith.constant 0 : index
    %c0_4 = arith.constant 0 : index
    %5 = vector.load %arg4[%c0_3, %c0_4] : memref<1x128xf32, #tpu.memory_space<vmem>>, vector<1x128xf32>
    %6 = vector.broadcast %5 : vector<1x128xf32> to vector<512x128xf32>
    %7 = arith.addf %4, %6 : vector<512x128xf32>
    %c0_5 = arith.constant 0 : index
    %c0_6 = arith.constant 0 : index
    %8 = vector.load %arg5[%c0_5, %c0_6] : memref<512x128xbf16, #tpu.memory_space<vmem>>, vector<512x128xbf16>
    %9 = arith.extf %8 : vector<512x128xbf16> to vector<512x128xf32>
    %c0_7 = arith.constant 0 : index
    %c0_8 = arith.constant 0 : index
    %10 = vector.load %arg6[%c0_7, %c0_8] : memref<1x128xf32, #tpu.memory_space<vmem>>, vector<1x128xf32>
    %11 = vector.broadcast %10 : vector<1x128xf32> to vector<512x128xf32>
    %12 = arith.mulf %9, %11 : vector<512x128xf32>
    %c0_9 = arith.constant 0 : index
    %c0_10 = arith.constant 0 : index
    %13 = vector.load %arg7[%c0_9, %c0_10] : memref<1x128xf32, #tpu.memory_space<vmem>>, vector<1x128xf32>
    %14 = vector.broadcast %13 : vector<1x128xf32> to vector<512x128xf32>
    %15 = arith.addf %12, %14 : vector<512x128xf32>
    %16 = arith.addf %7, %15 : vector<512x128xf32>
    %cst = arith.constant 0.000000e+00 : f32
    %17 = vector.broadcast %cst : f32 to vector<512x128xf32>
    %18 = arith.maximumf %16, %17 : vector<512x128xf32>
    %c0_11 = arith.constant 0 : index
    %c0_12 = arith.constant 0 : index
    %19 = vector.load %arg8[%c0_11, %c0_12] : memref<512x128xf32, #tpu.memory_space<vmem>>, vector<512x128xf32>
    tpu.vector_store %arg8[%c0_11, %c0_12], %18 {strides = array<i32>} : memref<512x128xf32, #tpu.memory_space<vmem>>, vector<512x128xf32>,
    return
  }
  func.func @transform_0(%arg0: i32, %arg1: i32) -> (i32, i32) {
    %c0_i32 = arith.constant 0 : i32
    return %arg0, %arg1 : i32, i32
  }
  func.func @transform_1(%arg0: i32, %arg1: i32) -> (i32, i32) {
    %c0_i32 = arith.constant 0 : i32
    %c0_i32_0 = arith.constant 0 : i32
    return %c0_i32, %arg1 : i32, i32
  }
  func.func @transform_2(%arg0: i32, %arg1: i32) -> (i32, i32) {
    %c0_i32 = arith.constant 0 : i32
    %c0_i32_0 = arith.constant 0 : i32
    return %c0_i32, %arg1 : i32, i32
  }
  func.func @transform_3(%arg0: i32, %arg1: i32) -> (i32, i32) {
    %c0_i32 = arith.constant 0 : i32
    return %arg0, %arg1 : i32, i32
  }
  func.func @transform_4(%arg0: i32, %arg1: i32) -> (i32, i32) {
    %c0_i32 = arith.constant 0 : i32
    %c0_i32_0 = arith.constant 0 : i32
    return %c0_i32, %arg1 : i32, i32
  }
  func.func @transform_5(%arg0: i32, %arg1: i32) -> (i32, i32) {
    %c0_i32 = arith.constant 0 : i32
    %c0_i32_0 = arith.constant 0 : i32
    return %c0_i32, %arg1 : i32, i32
  }
  func.func @transform_6(%arg0: i32, %arg1: i32) -> (i32, i32) {
    %c0_i32 = arith.constant 0 : i32
    return %arg0, %arg1 : i32, i32
  }
}

</mosaic_0001>

<bundles_post_ra>
// kernel: a_call__.5
= control target key start
LH: loop header
LB: loop body
LE: loop exit
PB: predicated region body
PF: predicated region fallthrough
CT: control target
= control target key end

     0   :  { %s1797_s1 = inlined_call_operand.vmem [shape: bf16[128,128], index: 1, kind: input, shape index: {}]   ;;  %s1798_s0 = inlined_call_operand.vmem [shape: bf16[512,128], index: 0, kind: input, shape index: {}]   ;;  %s1799_s2 = inlined_call_operand.vmem [shape: bf16[512,128], index: 2, kind: output, shape index: {0}]   ;;  %s1800_s3 = inlined_call_operand.vmem [shape: f32[8,128], index: 3, kind: output, shape index: {1}]   ;;  %s1801_s4 = inlined_call_operand.vmem [shape: f32[8,128], index: 4, kind: output, shape index: {2}]  }
   0x1   :  { %v1046_v0 = vld [vmem:[%s1797_s1 + $0x38] sm:$0xff]  ;;  %v1045_v1 = vld [vmem:[%s1797_s1 + $0x30] sm:$0xff]  ;;  %v1044_v2 = vld [vmem:[%s1797_s1 + $0x28] sm:$0xff] }
   0x2   :  { %334 = vmatpush.bf16.msra.mxu0 %v1046_v0  ;;  %1238 = vmatpush.bf16.msra.mxu1 %v1046_v0  ;;  %v1043_v3 = vld [vmem:[%s1797_s1 + $0x20] sm:$0xff]  ;;  %v1042_v4 = vld [vmem:[%s1797_s1 + $0x18] sm:$0xff]  ;;  %v1041_v5 = vld [vmem:[%s1797_s1 + $0x10] sm:$0xff] }
   0x3   :  { %1239 = vmatpush.bf16.msra.mxu2 %v1046_v0  ;;  %1240 = vmatpush.bf16.msra.mxu3 %v1046_v0  ;;  %v1040_v6 = vld [vmem:[%s1797_s1 + $0x8] sm:$0xff]  ;;  %v1039_v7 = vld [vmem:[%s1797_s1] sm:$0xff]  ;;  %v1009_v13 = vld [vmem:[%s1798_s0 + $0x10] sm:$0xff] }
   0x4   :  { %v1007_v8 = vld [vmem:[%s1798_s0] sm:$0xff]  ;;  %v1008_v10 = vld [vmem:[%s1798_s0 + $0x8] sm:$0xff]  ;;  %v1017_v14 = vld [vmem:[%s1798_s0 + $0x50] sm:$0xff] }
   0x5   :  { %v1015_v9 = vld [vmem:[%s1798_s0 + $0x40] sm:$0xff]  ;;  %v1016_v11 = vld [vmem:[%s1798_s0 + $0x48] sm:$0xff]  ;;  %v1010_v16 = vld [vmem:[%s1798_s0 + $0x18] sm:$0xff] }
   0x6   :  { %335 = vmatpush.bf16.msra.mxu0 %v1045_v1  ;;  %1241 = vmatpush.bf16.msra.mxu1 %v1045_v1  ;;  %v1023_v12 = vld [vmem:[%s1798_s0 + $0x80] sm:$0xff]  ;;  %v1024_v15 = vld [vmem:[%s1798_s0 + $0x88] sm:$0xff]  ;;  %v1018_v17 = vld [vmem:[%s1798_s0 + $0x58] sm:$0xff] }
   0x7   :  { %1242 = vmatpush.bf16.msra.mxu2 %v1045_v1  ;;  %1243 = vmatpush.bf16.msra.mxu3 %v1045_v1  ;;  %v1025_v18 = vld [vmem:[%s1798_s0 + $0x90] sm:$0xff]  ;;  %v1031_v19 = vld [vmem:[%s1798_s0 + $0xc0] sm:$0xff]  ;;  %v1026_v22 = vld [vmem:[%s1798_s0 + $0x98] sm:$0xff] }
   0x8   :  { %v1011_v20 = vld [vmem:[%s1798_s0 + $0x20] sm:$0xff]  ;;  %v1032_v23 = vld [vmem:[%s1798_s0 + $0xc8] sm:$0xff]  ;;  %v1033_v27 = vld [vmem:[%s1798_s0 + $0xd0] sm:$0xff] }
   0x9   :  { %v1019_v21 = vld [vmem:[%s1798_s0 + $0x60] sm:$0xff]  ;;  %v1012_v24 = vld [vmem:[%s1798_s0 + $0x28] sm:$0xff]  ;;  %v1013_v28 = vld [vmem:[%s1798_s0 + $0x30] sm:$0xff] }
   0xa   :  { %336 = vmatpush.bf16.msra.mxu0 %v1044_v2  ;;  %1244 = vmatpush.bf16.msra.mxu1 %v1044_v2  ;;  %v1020_v25 = vld [vmem:[%s1798_s0 + $0x68] sm:$0xff]  ;;  %v1027_v26 = vld [vmem:[%s1798_s0 + $0xa0] sm:$0xff]  ;;  %v1021_v29 = vld [vmem:[%s1798_s0 + $0x70] sm:$0xff] }
   0xb   :  { %1245 = vmatpush.bf16.msra.mxu2 %v1044_v2  ;;  %1246 = vmatpush.bf16.msra.mxu3 %v1044_v2  ;;  %v1028_v30 = vld [vmem:[%s1798_s0 + $0xa8] sm:$0xff]  ;;  %v1034_v31 = vld [vmem:[%s1798_s0 + $0xd8] sm:$0xff]  ;;  %v1029_v34 = vld [vmem:[%s1798_s0 + $0xb0] sm:$0xff] }
   0xc   :  { %v1014_v32 = vld [vmem:[%s1798_s0 + $0x38] sm:$0xff]  ;;  %v1035_v35 = vld [vmem:[%s1798_s0 + $0xe0] sm:$0xff]  ;;  %v1036_v39 = vld [vmem:[%s1798_s0 + $0xe8] sm:$0xff] }
   0xd   :  { %v1022_v33 = vld [vmem:[%s1798_s0 + $0x78] sm:$0xff]  ;;  %v1037_v53 = vld [vmem:[%s1798_s0 + $0xf0] sm:$0xff] }
   0xe   :  { %337 = vmatpush.bf16.msra.mxu0 %v1043_v3  ;;  %1247 = vmatpush.bf16.msra.mxu1 %v1043_v3  ;;  %v1030_v38 = vld [vmem:[%s1798_s0 + $0xb8] sm:$0xff] }
   0xf   :  { %1248 = vmatpush.bf16.msra.mxu2 %v1043_v3  ;;  %1249 = vmatpush.bf16.msra.mxu3 %v1043_v3 }
  0x12   :  { %338 = vmatpush.bf16.msra.mxu0 %v1042_v4  ;;  %1250 = vmatpush.bf16.msra.mxu1 %v1042_v4 }
  0x13   :  { %1251 = vmatpush.bf16.msra.mxu2 %v1042_v4  ;;  %1252 = vmatpush.bf16.msra.mxu3 %v1042_v4 }
  0x16   :  { %339 = vmatpush.bf16.msra.mxu0 %v1041_v5  ;;  %1253 = vmatpush.bf16.msra.mxu1 %v1041_v5 }
  0x17   :  { %1254 = vmatpush.bf16.msra.mxu2 %v1041_v5  ;;  %1255 = vmatpush.bf16.msra.mxu3 %v1041_v5  ;;  %v1038_v5 = vld [vmem:[%s1798_s0 + $0xf8] sm:$0xff] }
  0x1a   :  { %340 = vmatpush.bf16.msra.mxu0 %v1040_v6  ;;  %1256 = vmatpush.bf16.msra.mxu1 %v1040_v6 }
  0x1b   :  { %1257 = vmatpush.bf16.msra.mxu2 %v1040_v6  ;;  %1258 = vmatpush.bf16.msra.mxu3 %v1040_v6 }
  0x1e   :  { %341 = vmatpush.bf16.msra.mxu0 %v1039_v7  ;;  %1259 = vmatpush.bf16.msra.mxu1 %v1039_v7 }
  0x1f   :  { %1260 = vmatpush.bf16.msra.mxu2 %v1039_v7  ;;  %1261 = vmatpush.bf16.msra.mxu3 %v1039_v7 }
  0x21   :  { %342 = vmatmul.bf16.vlgmr.msra.gmra.mxu0 %v1007_v8  ;;  %382 = vmatmul.bf16.vlgmr.msra.gmra.mxu1 %v1015_v9 }
  0x22   :  { %422 = vmatmul.bf16.vlgmr.msra.gmra.mxu2 %v1023_v12  ;;  %462 = vmatmul.bf16.vlgmr.msra.gmra.mxu3 %v1031_v19 }
  0x31   :  { %347 = vmatmul.bf16.gmra.mxu0 %v1008_v10  ;;  %387 = vmatmul.bf16.gmra.mxu1 %v1016_v11 }
  0x32   :  { %427 = vmatmul.bf16.gmra.mxu2 %v1024_v15  ;;  %467 = vmatmul.bf16.gmra.mxu3 %v1032_v23 }
  0x41   :  { %352 = vmatmul.bf16.gmra.mxu0 %v1009_v13  ;;  %392 = vmatmul.bf16.gmra.mxu1 %v1017_v14 }
  0x42   :  { %432 = vmatmul.bf16.gmra.mxu2 %v1025_v18  ;;  %472 = vmatmul.bf16.gmra.mxu3 %v1033_v27 }
  0x51   :  { %357 = vmatmul.bf16.gmra.mxu0 %v1010_v16  ;;  %397 = vmatmul.bf16.gmra.mxu1 %v1018_v17 }
  0x52   :  { %437 = vmatmul.bf16.gmra.mxu2 %v1026_v22  ;;  %477 = vmatmul.bf16.gmra.mxu3 %v1034_v31 }
  0x61   :  { %362 = vmatmul.bf16.gmra.mxu0 %v1011_v20  ;;  %402 = vmatmul.bf16.gmra.mxu1 %v1019_v21 }
  0x62   :  { %442 = vmatmul.bf16.gmra.mxu2 %v1027_v26  ;;  %482 = vmatmul.bf16.gmra.mxu3 %v1035_v35 }
  0x71   :  { %367 = vmatmul.bf16.gmra.mxu0 %v1012_v24  ;;  %407 = vmatmul.bf16.gmra.mxu1 %v1020_v25 }
  0x72   :  { %447 = vmatmul.bf16.gmra.mxu2 %v1028_v30  ;;  %487 = vmatmul.bf16.gmra.mxu3 %v1036_v39 }
  0x81   :  { %372 = vmatmul.bf16.gmra.mxu0 %v1013_v28  ;;  %412 = vmatmul.bf16.gmra.mxu1 %v1021_v29 }
  0x82   :  { %452 = vmatmul.bf16.gmra.mxu2 %v1029_v34  ;;  %492 = vmatmul.bf16.gmra.mxu3 %v1037_v53 }
  0x91   :  { %377 = vmatmul.bf16.gmra.mxu0 %v1014_v32  ;;  %417 = vmatmul.bf16.gmra.mxu1 %v1022_v33 }
  0x92   :  { %457 = vmatmul.bf16.gmra.mxu2 %v1030_v38  ;;  %497 = vmatmul.bf16.gmra.mxu3 %v1038_v5 }
  0x9e   :  { %v343_v36 = vpop.f32.mrf.mxu0  ;;  %v1395_v37 = vpop.f32.mrf.mxu1 }
  0x9f   :  { %v701_v40 = vmul.f32 %v343_v36, %v343_v36 }
  0xa5   :  { %v1422_v60 = vpop.f32.mrf.mxu2  ;;  %v1473_v20 = vpop.f32.mrf.mxu3 }
  0xa6   :  { %v345_v41 = vpop.f32.mrf.mxu0  ;;  %v1403_v42 = vpop.f32.mrf.mxu1 }
  0xa7   :  { %v1050_v43 = vpack.c.bf16 %v345_v41, %v343_v36  ;;  %v631_v44 = vadd.f32 %v345_v41, %v343_v36  ;;  %v702_v45 = vmul.f32 %v345_v41, %v345_v41  ;;  %v1090_v46 = vpack.c.bf16 %v1403_v42, %v1395_v37 }
  0xa9   :  { %1051 = vst [vmem:[%s1799_s2] sm:$0xff] %v1050_v43   ;;  %v765_v47 = vadd.f32 %v702_v45, %v701_v40 }
  0xaa   :  { %1214 = vst [vmem:[%s1799_s2 + $0x40] sm:$0xff] %v1090_v46  }
  0xad   :  { %v1434_v2 = vpop.f32.mrf.mxu2  ;;  %v1485_v24 = vpop.f32.mrf.mxu3 }
  0xae   :  { %v348_v48 = vpop.f32.mrf.mxu0  ;;  %v1413_v49 = vpop.f32.mrf.mxu1  ;;  %v1130_v3 = vpack.c.bf16 %v1434_v2, %v1422_v60  ;;  %v1170_v26 = vpack.c.bf16 %v1485_v24, %v1473_v20 }
  0xaf   :  { %v632_v50 = vadd.f32 %v631_v44, %v348_v48  ;;  %v703_v51 = vmul.f32 %v348_v48, %v348_v48 }
  0xb0   :  { %1222 = vst [vmem:[%s1799_s2 + $0x80] sm:$0xff] %v1130_v3  }
  0xb1   :  { %v766_v52 = vadd.f32 %v765_v47, %v703_v51  ;;  %1230 = vst [vmem:[%s1799_s2 + $0xc0] sm:$0xff] %v1170_v26  }
  0xb5   :  { %v1450_v10 = vpop.f32.mrf.mxu2  ;;  %v1503_v32 = vpop.f32.mrf.mxu3 }
  0xb6   :  { %v350_v54 = vpop.f32.mrf.mxu0  ;;  %v1418_v55 = vpop.f32.mrf.mxu1 }
  0xb7   :  { %v1055_v56 = vpack.c.bf16 %v350_v54, %v348_v48  ;;  %v633_v57 = vadd.f32 %v632_v50, %v350_v54  ;;  %v704_v58 = vmul.f32 %v350_v54, %v350_v54  ;;  %v1095_v59 = vpack.c.bf16 %v1418_v55, %v1413_v49 }
  0xb9   :  { %1207 = vst [vmem:[%s1799_s2 + $0x8] sm:$0xff] %v1055_v56   ;;  %v767_v61 = vadd.f32 %v766_v52, %v704_v58 }
  0xba   :  { %1215 = vst [vmem:[%s1799_s2 + $0x48] sm:$0xff] %v1095_v59  }
  0xbd   :  { %v1460_v13 = vpop.f32.mrf.mxu2  ;;  %v1515_v36 = vpop.f32.mrf.mxu3 }
  0xbe   :  { %v353_v62 = vpop.f32.mrf.mxu0  ;;  %v1430_v63 = vpop.f32.mrf.mxu1  ;;  %v1135_v14 = vpack.c.bf16 %v1460_v13, %v1450_v10  ;;  %v1175_v39 = vpack.c.bf16 %v1515_v36, %v1503_v32 }
  0xbf   :  { %v1432_v0 = vadd.f32 %v633_v57, %v353_v62  ;;  %v705_v1 = vmul.f32 %v353_v62, %v353_v62 }
  0xc0   :  { %1223 = vst [vmem:[%s1799_s2 + $0x88] sm:$0xff] %v1135_v14  }
  0xc1   :  { %v1438_v4 = vadd.f32 %v767_v61, %v705_v1  ;;  %1231 = vst [vmem:[%s1799_s2 + $0xc8] sm:$0xff] %v1175_v39  }
  0xc5   :  { %v1471_v19 = vpop.f32.mrf.mxu2  ;;  %v1533_v46 = vpop.f32.mrf.mxu3 }
  0xc6   :  { %v355_v6 = vpop.f32.mrf.mxu0  ;;  %v1446_v7 = vpop.f32.mrf.mxu1 }
  0xc7   :  { %v1060_v8 = vpack.c.bf16 %v355_v6, %v353_v62  ;;  %v1100_v9 = vpack.c.bf16 %v1446_v7, %v1430_v63  ;;  %v706_v52 = vmul.f32 %v355_v6, %v355_v6  ;;  %v635_v57 = vadd.f32 %v1432_v0, %v355_v6 }
  0xc9   :  { %1208 = vst [vmem:[%s1799_s2 + $0x10] sm:$0xff] %v1060_v8   ;;  %v769_v58 = vadd.f32 %v1438_v4, %v706_v52 }
  0xca   :  { %1216 = vst [vmem:[%s1799_s2 + $0x50] sm:$0xff] %v1100_v9  }
  0xcd   :  { %v1483_v23 = vpop.f32.mrf.mxu2  ;;  %v1545_v51 = vpop.f32.mrf.mxu3 }
  0xce   :  { %v358_v11 = vpop.f32.mrf.mxu0  ;;  %v1458_v12 = vpop.f32.mrf.mxu1  ;;  %v1140_v25 = vpack.c.bf16 %v1483_v23, %v1471_v19  ;;  %v1180_v54 = vpack.c.bf16 %v1545_v51, %v1533_v46 }
  0xcf   :  { %v707_v56 = vmul.f32 %v358_v11, %v358_v11  ;;  %v636_v61 = vadd.f32 %v635_v57, %v358_v11 }
  0xd0   :  { %1224 = vst [vmem:[%s1799_s2 + $0x90] sm:$0xff] %v1140_v25  }
  0xd1   :  { %1232 = vst [vmem:[%s1799_s2 + $0xd0] sm:$0xff] %v1180_v54   ;;  %v770_v62 = vadd.f32 %v769_v58, %v707_v56 }
  0xd5   :  { %v1501_v31 = vpop.f32.mrf.mxu2  ;;  %v1565_v0 = vpop.f32.mrf.mxu3 }
  0xd6   :  { %v360_v15 = vpop.f32.mrf.mxu0  ;;  %v1467_v16 = vpop.f32.mrf.mxu1 }
  0xd7   :  { %v1065_v17 = vpack.c.bf16 %v360_v15, %v358_v11  ;;  %v1105_v18 = vpack.c.bf16 %v1467_v16, %v1458_v12  ;;  %v708_v59 = vmul.f32 %v360_v15, %v360_v15  ;;  %v637_v8 = vadd.f32 %v636_v61, %v360_v15 }
  0xd9   :  { %1209 = vst [vmem:[%s1799_s2 + $0x18] sm:$0xff] %v1065_v17   ;;  %v771_v6 = vadd.f32 %v770_v62, %v708_v59 }
  0xda   :  { %1217 = vst [vmem:[%s1799_s2 + $0x58] sm:$0xff] %v1105_v18  }
  0xdd   :  { %v1513_v35 = vpop.f32.mrf.mxu2 }
  0xde   :  { %v363_v21 = vpop.f32.mrf.mxu0  ;;  %v1481_v22 = vpop.f32.mrf.mxu1  ;;  %v1145_v38 = vpack.c.bf16 %v1513_v35, %v1501_v31 }
  0xdf   :  { %v709_v1 = vmul.f32 %v363_v21, %v363_v21  ;;  %v638_v25 = vadd.f32 %v637_v8, %v363_v21 }
  0xe0   :  { %1225 = vst [vmem:[%s1799_s2 + $0x98] sm:$0xff] %v1145_v38  }
  0xe1   :  { %v772_v4 = vadd.f32 %v771_v6, %v709_v1 }
  0xe5   :  { %v1531_v45 = vpop.f32.mrf.mxu2 }
  0xe6   :  { %v365_v27 = vpop.f32.mrf.mxu0  ;;  %v1497_v28 = vpop.f32.mrf.mxu1 }
  0xe7   :  { %v1070_v29 = vpack.c.bf16 %v365_v27, %v363_v21  ;;  %v1110_v30 = vpack.c.bf16 %v1497_v28, %v1481_v22  ;;  %v710_v18 = vmul.f32 %v365_v27, %v365_v27  ;;  %v639_v15 = vadd.f32 %v638_v25, %v365_v27 }
  0xe9   :  { %1210 = vst [vmem:[%s1799_s2 + $0x20] sm:$0xff] %v1070_v29   ;;  %v773_v26 = vadd.f32 %v772_v4, %v710_v18 }
  0xea   :  { %1218 = vst [vmem:[%s1799_s2 + $0x60] sm:$0xff] %v1110_v30  }
  0xed   :  { %v1543_v50 = vpop.f32.mrf.mxu2 }
  0xee   :  { %v368_v33 = vpop.f32.mrf.mxu0  ;;  %v1511_v34 = vpop.f32.mrf.mxu1  ;;  %v1150_v53 = vpack.c.bf16 %v1543_v50, %v1531_v45 }
  0xef   :  { %v711_v11 = vmul.f32 %v368_v33, %v368_v33  ;;  %v640_v30 = vadd.f32 %v639_v15, %v368_v33 }
  0xf0   :  { %1226 = vst [vmem:[%s1799_s2 + $0xa0] sm:$0xff] %v1150_v53   ;;  %v1577_v53 = vpop.f32.mrf.mxu3 }
  0xf1   :  { %v774_v38 = vadd.f32 %v773_v26, %v711_v11  ;;  %v1185_v27 = vpack.c.bf16 %v1577_v53, %v1565_v0  ;;  %v718_v26 = vmul.f32 %v1403_v42, %v1403_v42 }
  0xf3   :  { %1233 = vst [vmem:[%s1799_s2 + $0xd8] sm:$0xff] %v1185_v27  }
  0xf5   :  { %v1563_v17 = vpop.f32.mrf.mxu2 }
  0xf6   :  { %v370_v40 = vpop.f32.mrf.mxu0  ;;  %v1527_v41 = vpop.f32.mrf.mxu1 }
  0xf7   :  { %v1075_v43 = vpack.c.bf16 %v370_v40, %v368_v33  ;;  %v1115_v44 = vpack.c.bf16 %v1527_v41, %v1511_v34  ;;  %v712_v29 = vmul.f32 %v370_v40, %v370_v40  ;;  %v641_v21 = vadd.f32 %v640_v30, %v370_v40 }
  0xf8   :  { %v1595_v4 = vpop.f32.mrf.mxu3 }
  0xf9   :  { %1211 = vst [vmem:[%s1799_s2 + $0x28] sm:$0xff] %v1075_v43   ;;  %v775_v54 = vadd.f32 %v774_v38, %v712_v29  ;;  %v719_v38 = vmul.f32 %v1413_v49, %v1413_v49 }
  0xfa   :  { %1219 = vst [vmem:[%s1799_s2 + $0x68] sm:$0xff] %v1115_v44  }
  0xfd   :  { %v1575_v52 = vpop.f32.mrf.mxu2 }
  0xfe   :  { %v373_v47 = vpop.f32.mrf.mxu0  ;;  %v1541_v48 = vpop.f32.mrf.mxu1  ;;  %v1155_v57 = vpack.c.bf16 %v1575_v52, %v1563_v17 }
  0xff   :  { %v713_v39 = vmul.f32 %v373_v47, %v373_v47  ;;  %v642_v58 = vadd.f32 %v641_v21, %v373_v47 }
 0x100   :  { %1227 = vst [vmem:[%s1799_s2 + $0xa8] sm:$0xff] %v1155_v57   ;;  %v1617_v57 = vpop.f32.mrf.mxu3 }
 0x101   :  { %v776_v33 = vadd.f32 %v775_v54, %v713_v39  ;;  %v1190_v27 = vpack.c.bf16 %v1617_v57, %v1595_v4 }
 0x103   :  { %1234 = vst [vmem:[%s1799_s2 + $0xe0] sm:$0xff] %v1190_v27  }
 0x105   :  { %v1593_v25 = vpop.f32.mrf.mxu2 }
 0x106   :  { %v375_v3 = vpop.f32.mrf.mxu0  ;;  %v1559_v5 = vpop.f32.mrf.mxu1 }
 0x107   :  { %v1080_v9 = vpack.c.bf16 %v375_v3, %v373_v47  ;;  %v1120_v14 = vpack.c.bf16 %v1559_v5, %v1541_v48  ;;  %v714_v56 = vmul.f32 %v375_v3, %v375_v3  ;;  %v643_v40 = vadd.f32 %v642_v58, %v375_v3 }
 0x108   :  { %v717_v3 = vmul.f32 %v1395_v37, %v1395_v37  ;;  %v730_v27 = vmul.f32 %v1559_v5, %v1559_v5 }
 0x109   :  { %1212 = vst [vmem:[%s1799_s2 + $0x30] sm:$0xff] %v1080_v9   ;;  %v777_v61 = vadd.f32 %v776_v33, %v714_v56 }
 0x10a   :  { %1220 = vst [vmem:[%s1799_s2 + $0x70] sm:$0xff] %v1120_v14  }
 0x10d   :  { %v1615_v56 = vpop.f32.mrf.mxu2 }
 0x10e   :  { %v378_v43 = vpop.f32.mrf.mxu0  ;;  %v1573_v44 = vpop.f32.mrf.mxu1 }
 0x10f   :  { %v715_v59 = vmul.f32 %v378_v43, %v378_v43  ;;  %v644_v62 = vadd.f32 %v643_v40, %v378_v43 }
 0x111   :  { %v778_v1 = vadd.f32 %v777_v61, %v715_v59  ;;  %v723_v61 = vmul.f32 %v1458_v12, %v1458_v12 }
 0x116   :  { %v380_v8 = vpop.f32.mrf.mxu0  ;;  %v1589_v9 = vpop.f32.mrf.mxu1 }
 0x117   :  { %v1085_v14 = vpack.c.bf16 %v380_v8, %v378_v43  ;;  %v645_v6 = vadd.f32 %v644_v62, %v380_v8  ;;  %v716_v47 = vmul.f32 %v380_v8, %v380_v8  ;;  %v1125_v18 = vpack.c.bf16 %v1589_v9, %v1573_v44 }
 0x119   :  { %1213 = vst [vmem:[%s1799_s2 + $0x38] sm:$0xff] %v1085_v14   ;;  %v646_v11 = vadd.f32 %v645_v6, %v1395_v37  ;;  %v779_v15 = vadd.f32 %v778_v1, %v716_v47  ;;  %v720_v37 = vmul.f32 %v1418_v55, %v1418_v55  ;;  %v724_v1 = vmul.f32 %v1467_v16, %v1467_v16  ;;  %v1641_v6 = vpop.f32.mrf.mxu2 }
 0x11a   :  { %1221 = vst [vmem:[%s1799_s2 + $0x78] sm:$0xff] %v1125_v18   ;;  %v725_v47 = vmul.f32 %v1481_v22, %v1481_v22 }
 0x11b   :  { %v647_v29 = vadd.f32 %v646_v11, %v1403_v42  ;;  %v780_v30 = vadd.f32 %v779_v15, %v717_v3  ;;  %v1160_v42 = vpack.c.bf16 %v1615_v56, %v1593_v25  ;;  %v726_v11 = vmul.f32 %v1497_v28, %v1497_v28 }
 0x11d   :  { %v648_v39 = vadd.f32 %v647_v29, %v1413_v49  ;;  %v781_v43 = vadd.f32 %v780_v30, %v718_v26  ;;  %v721_v49 = vmul.f32 %v1430_v63, %v1430_v63  ;;  %1228 = vst [vmem:[%s1799_s2 + $0xb0] sm:$0xff] %v1160_v42   ;;  %v728_v30 = vmul.f32 %v1527_v41, %v1527_v41 }
 0x11f   :  { %v649_v21 = vadd.f32 %v648_v39, %v1418_v55  ;;  %v782_v54 = vadd.f32 %v781_v43, %v719_v38  ;;  %v722_v55 = vmul.f32 %v1446_v7, %v1446_v7 }
 0x121   :  { %v650_v58 = vadd.f32 %v649_v21, %v1430_v63  ;;  %v783_v33 = vadd.f32 %v782_v54, %v720_v37 }
 0x123   :  { %v651_v59 = vadd.f32 %v650_v58, %v1446_v7  ;;  %v784_v40 = vadd.f32 %v783_v33, %v721_v49  ;;  %v1643_v7 = vpop.f32.mrf.mxu3 }
 0x125   :  { %v785_v62 = vadd.f32 %v784_v40, %v722_v55  ;;  %v652_v63 = vadd.f32 %v651_v59, %v1458_v12  ;;  %v732_v59 = vmul.f32 %v1589_v9, %v1589_v9 }
 0x127   :  { %v653_v8 = vadd.f32 %v652_v63, %v1467_v16  ;;  %v786_v14 = vadd.f32 %v785_v62, %v723_v61  ;;  %v727_v16 = vmul.f32 %v1511_v34, %v1511_v34  ;;  %v734_v63 = vmul.f32 %v1434_v2, %v1434_v2 }
 0x129   :  { %v654_v18 = vadd.f32 %v653_v8, %v1481_v22  ;;  %v787_v3 = vadd.f32 %v786_v14, %v724_v1  ;;  %v1657_v22 = vpop.f32.mrf.mxu2  ;;  %v735_v8 = vmul.f32 %v1450_v10, %v1450_v10 }
 0x12b   :  { %v655_v12 = vadd.f32 %v654_v18, %v1497_v28  ;;  %v788_v15 = vadd.f32 %v787_v3, %v725_v47  ;;  %v1659_v43 = vpop.f32.mrf.mxu3  ;;  %v1165_v28 = vpack.c.bf16 %v1657_v22, %v1641_v6  ;;  %v736_v47 = vmul.f32 %v1460_v13, %v1460_v13 }
 0x12c   :  { %v1195_v37 = vpack.c.bf16 %v1659_v43, %v1643_v7 }
 0x12d   :  { %v656_v26 = vadd.f32 %v655_v12, %v1511_v34  ;;  %v789_v29 = vadd.f32 %v788_v15, %v726_v11  ;;  %v729_v34 = vmul.f32 %v1541_v48, %v1541_v48  ;;  %1229 = vst [vmem:[%s1799_s2 + $0xb8] sm:$0xff] %v1165_v28  }
 0x12e   :  { %1235 = vst [vmem:[%s1799_s2 + $0xe8] sm:$0xff] %v1195_v37   ;;  %v741_v37 = vmul.f32 %v1531_v45, %v1531_v45 }
 0x12f   :  { %v657_v38 = vadd.f32 %v656_v26, %v1527_v41  ;;  %v790_v39 = vadd.f32 %v789_v29, %v727_v16  ;;  %v739_v26 = vmul.f32 %v1501_v31, %v1501_v31 }
 0x131   :  { %v658_v21 = vadd.f32 %v657_v38, %v1541_v48  ;;  %v791_v54 = vadd.f32 %v790_v39, %v728_v30  ;;  %v731_v48 = vmul.f32 %v1573_v44, %v1573_v44 }
 0x133   :  { %v792_v41 = vadd.f32 %v791_v54, %v729_v34  ;;  %v659_v42 = vadd.f32 %v658_v21, %v1559_v5  ;;  %v1683_v40 = vpop.f32.mrf.mxu3  ;;  %v733_v5 = vmul.f32 %v1422_v60, %v1422_v60  ;;  %v742_v34 = vmul.f32 %v1543_v50, %v1543_v50 }
 0x135   :  { %v793_v49 = vadd.f32 %v792_v41, %v730_v27  ;;  %v660_v58 = vadd.f32 %v659_v42, %v1573_v44  ;;  %v743_v41 = vmul.f32 %v1563_v17, %v1563_v17 }
 0x137   :  { %v794_v33 = vadd.f32 %v793_v49, %v731_v48  ;;  %v661_v55 = vadd.f32 %v660_v58, %v1589_v9  ;;  %v744_v49 = vmul.f32 %v1575_v52, %v1575_v52 }
 0x139   :  { %v662_v61 = vadd.f32 %v661_v55, %v1422_v60  ;;  %v795_v62 = vadd.f32 %v794_v33, %v732_v59 }
 0x13b   :  { %v663_v1 = vadd.f32 %v662_v61, %v1434_v2  ;;  %v796_v44 = vadd.f32 %v795_v62, %v733_v5  ;;  %v1697_v60 = vpop.f32.mrf.mxu3  ;;  %v737_v2 = vmul.f32 %v1471_v19, %v1471_v19  ;;  %v747_v62 = vmul.f32 %v1641_v6, %v1641_v6 }
 0x13c   :  { %v1200_v11 = vpack.c.bf16 %v1697_v60, %v1683_v40 }
 0x13d   :  { %v664_v14 = vadd.f32 %v663_v1, %v1450_v10  ;;  %v797_v9 = vadd.f32 %v796_v44, %v734_v63  ;;  %v738_v10 = vmul.f32 %v1483_v23, %v1483_v23  ;;  %v749_v44 = vmul.f32 %v1473_v20, %v1473_v20 }
 0x13e   :  { %1236 = vst [vmem:[%s1799_s2 + $0xf0] sm:$0xff] %v1200_v11  }
 0x13f   :  { %v665_v18 = vadd.f32 %v664_v14, %v1460_v13  ;;  %v798_v3 = vadd.f32 %v797_v9, %v735_v8 }
 0x141   :  { %v666_v12 = vadd.f32 %v665_v18, %v1471_v19  ;;  %v799_v15 = vadd.f32 %v798_v3, %v736_v47  ;;  %v740_v19 = vmul.f32 %v1513_v35, %v1513_v35 }
 0x143   :  { %v667_v13 = vadd.f32 %v666_v12, %v1483_v23  ;;  %v800_v16 = vadd.f32 %v799_v15, %v737_v2  ;;  %v1716_v28 = vpop.f32.mrf.mxu3 }
 0x145   :  { %v801_v29 = vadd.f32 %v800_v16, %v738_v10  ;;  %v668_v30 = vadd.f32 %v667_v13, %v1501_v31 }
 0x147   :  { %v669_v38 = vadd.f32 %v668_v30, %v1513_v35  ;;  %v802_v39 = vadd.f32 %v801_v29, %v739_v26 }
 0x149   :  { %v670_v23 = vadd.f32 %v669_v38, %v1531_v45  ;;  %v803_v21 = vadd.f32 %v802_v39, %v740_v19 }
 0x14b   :  { %v671_v54 = vadd.f32 %v670_v23, %v1543_v50  ;;  %v804_v31 = vadd.f32 %v803_v21, %v741_v37  ;;  %v500_v45 = vpop.f32.mrf.mxu3  ;;  %v745_v50 = vmul.f32 %v1593_v25, %v1593_v25 }
 0x14c   :  { %v1205_v48 = vpack.c.bf16 %v500_v45, %v1716_v28 }
 0x14d   :  { %v672_v35 = vadd.f32 %v671_v54, %v1563_v17  ;;  %v805_v42 = vadd.f32 %v804_v31, %v742_v34  ;;  %v760_v34 = vmul.f32 %v1659_v43, %v1659_v43 }
 0x14e   :  { %1237 = vst [vmem:[%s1799_s2 + $0xf8] sm:$0xff] %v1205_v48   ;;  %v764_v48 = vmul.f32 %v500_v45, %v500_v45 }
 0x14f   :  { %v673_v27 = vadd.f32 %v672_v35, %v1575_v52  ;;  %v806_v58 = vadd.f32 %v805_v42, %v743_v41  ;;  %v746_v52 = vmul.f32 %v1615_v56, %v1615_v56  ;;  %v761_v41 = vmul.f32 %v1683_v40, %v1683_v40 }
 0x150   :  { %v762_v42 = vmul.f32 %v1697_v60, %v1697_v60 }
 0x151   :  { %v807_v33 = vadd.f32 %v806_v58, %v744_v49  ;;  %v674_v55 = vadd.f32 %v673_v27, %v1593_v25  ;;  %v748_v25 = vmul.f32 %v1657_v22, %v1657_v22  ;;  %v763_v49 = vmul.f32 %v1716_v28, %v1716_v28 }
 0x153   :  { %v808_v17 = vadd.f32 %v807_v33, %v745_v50  ;;  %v675_v59 = vadd.f32 %v674_v55, %v1615_v56  ;;  %v750_v56 = vmul.f32 %v1485_v24, %v1485_v24 }
 0x155   :  { %v809_v5 = vadd.f32 %v808_v17, %v746_v52  ;;  %v676_v61 = vadd.f32 %v675_v59, %v1641_v6  ;;  %v751_v6 = vmul.f32 %v1503_v32, %v1503_v32 }
 0x157   :  { %v810_v63 = vadd.f32 %v809_v5, %v747_v62  ;;  %v677_v1 = vadd.f32 %v676_v61, %v1657_v22  ;;  %v752_v22 = vmul.f32 %v1515_v36, %v1515_v36 }
 0x159   :  { %v678_v8 = vadd.f32 %v677_v1, %v1473_v20  ;;  %v811_v14 = vadd.f32 %v810_v63, %v748_v25  ;;  %v753_v20 = vmul.f32 %v1533_v46, %v1533_v46 }
 0x15b   :  { %v679_v9 = vadd.f32 %v678_v8, %v1485_v24  ;;  %v812_v47 = vadd.f32 %v811_v14, %v749_v44  ;;  %v754_v24 = vmul.f32 %v1545_v51, %v1545_v51 }
 0x15d   :  { %v680_v18 = vadd.f32 %v679_v9, %v1503_v32  ;;  %v813_v3 = vadd.f32 %v812_v47, %v750_v56  ;;  %v755_v32 = vmul.f32 %v1565_v0, %v1565_v0 }
 0x15f   :  { %v681_v11 = vadd.f32 %v680_v18, %v1515_v36  ;;  %v814_v2 = vadd.f32 %v813_v3, %v751_v6  ;;  %v756_v36 = vmul.f32 %v1577_v53, %v1577_v53 }
 0x161   :  { %v682_v12 = vadd.f32 %v681_v11, %v1533_v46  ;;  %v815_v15 = vadd.f32 %v814_v2, %v752_v22  ;;  %v757_v46 = vmul.f32 %v1595_v4, %v1595_v4 }
 0x163   :  { %v683_v10 = vadd.f32 %v682_v12, %v1545_v51  ;;  %v816_v13 = vadd.f32 %v815_v15, %v753_v20  ;;  %v758_v51 = vmul.f32 %v1617_v57, %v1617_v57 }
 0x165   :  { %v817_v16 = vadd.f32 %v816_v13, %v754_v24  ;;  %v684_v26 = vadd.f32 %v683_v10, %v1565_v0  ;;  %v759_v0 = vmul.f32 %v1643_v7, %v1643_v7 }
 0x167   :  { %v685_v29 = vadd.f32 %v684_v26, %v1577_v53  ;;  %v818_v30 = vadd.f32 %v817_v16, %v755_v32 }
 0x169   :  { %v686_v19 = vadd.f32 %v685_v29, %v1595_v4  ;;  %v819_v38 = vadd.f32 %v818_v30, %v756_v36 }
 0x16b   :  { %v687_v39 = vadd.f32 %v686_v19, %v1617_v57  ;;  %v820_v37 = vadd.f32 %v819_v38, %v757_v46 }
 0x16d   :  { %v688_v23 = vadd.f32 %v687_v39, %v1643_v7  ;;  %v821_v21 = vadd.f32 %v820_v37, %v758_v51 }
 0x16f   :  { %v689_v53 = vadd.f32 %v688_v23, %v1659_v43  ;;  %v822_v54 = vadd.f32 %v821_v21, %v759_v0 }
 0x171   :  { %v823_v4 = vadd.f32 %v822_v54, %v760_v34  ;;  %v690_v31 = vadd.f32 %v689_v53, %v1683_v40 }
 0x173   :  { %v824_v57 = vadd.f32 %v823_v4, %v761_v41  ;;  %v691_v35 = vadd.f32 %v690_v31, %v1697_v60 }
 0x175   :  { %v825_v7 = vadd.f32 %v824_v57, %v762_v42  ;;  %v692_v27 = vadd.f32 %v691_v35, %v1716_v28 }
 0x177   :  { %v826_v43 = vadd.f32 %v825_v7, %v763_v49  ;;  %v693_v58 = vadd.f32 %v692_v27, %v500_v45 }
 0x179   :  { %v694_v33 = vrot.slane %v693_v58, 4  ;;  %v827_v55 = vadd.f32 %v826_v43, %v764_v48 }
 0x17b   :  { %v695_v50 = vadd.f32 %v694_v33, %v693_v58  ;;  %v828_v17 = vrot.slane %v827_v55, 4 }
 0x17d   :  { %v696_v40 = vrot.slane %v695_v50, 2  ;;  %v829_v59 = vadd.f32 %v828_v17, %v827_v55 }
 0x17f   :  { %v697_v52 = vadd.f32 %v696_v40, %v695_v50  ;;  %v830_v5 = vrot.slane %v829_v59, 2 }
 0x181   :  { %v698_v61 = vrot.slane %v697_v52, 1  ;;  %v831_v62 = vadd.f32 %v830_v5, %v829_v59 }
 0x183   :  { %v699_v60 = vadd.f32 %v698_v61, %v697_v52  ;;  %v832_v63 = vrot.slane %v831_v62, 1 }
 0x185   :  { %700 = vst [vmem:[%s1800_s3] sm:$0xff] %v699_v60  ;;  %v833_v28 = vadd.f32 %v832_v63, %v831_v62 }
 0x187   :  { %834 = vst [vmem:[%s1801_s4] sm:$0xff] %v833_v28 }

// kernel: a_call__.7
= control target key start
LH: loop header
LB: loop body
LE: loop exit
PB: predicated region body
PF: predicated region fallthrough
CT: control target
= control target key end

     0   :  { %s2056_s3 = inlined_call_operand.vmem [shape: bf16[128,128], index: 3, kind: input, shape index: {}]   ;;  %s2057_s1 = inlined_call_operand.vmem [shape: f32[1,128], index: 1, kind: input, shape index: {}]   ;;  %s2058_s2 = inlined_call_operand.vmem [shape: f32[1,128], index: 2, kind: input, shape index: {}]   ;;  %s2059_s0 = inlined_call_operand.vmem [shape: bf16[512,128], index: 0, kind: input, shape index: {}]   ;;  %s2060_s4 = inlined_call_operand.vmem [shape: bf16[512,128], index: 4, kind: output, shape index: {0}]   ;;  %s2061_s5 = inlined_call_operand.vmem [shape: f32[8,128], index: 5, kind: output, shape index: {1}]   ;;  %s2062_s6 = inlined_call_operand.vmem [shape: f32[8,128], index: 6, kind: output, shape index: {2}]  }
   0x1   :  { %v996_v0 = vld [vmem:[%s2056_s3 + $0x38] sm:$0xff]  ;;  %v995_v1 = vld [vmem:[%s2056_s3 + $0x30] sm:$0xff]  ;;  %v994_v2 = vld [vmem:[%s2056_s3 + $0x28] sm:$0xff] }
   0x2   :  { %444 = vmatpush.bf16.msra.mxu0 %v996_v0  ;;  %1347 = vmatpush.bf16.msra.mxu1 %v996_v0  ;;  %v993_v3 = vld [vmem:[%s2056_s3 + $0x20] sm:$0xff]  ;;  %v992_v8 = vld [vmem:[%s2056_s3 + $0x18] sm:$0xff]  ;;  %v991_v17 = vld [vmem:[%s2056_s3 + $0x10] sm:$0xff] }
   0x3   :  { %1348 = vmatpush.bf16.msra.mxu2 %v996_v0  ;;  %1349 = vmatpush.bf16.msra.mxu3 %v996_v0  ;;  %v998_v4 = vld [vmem:[%s2059_s0] sm:$0xff]   ;;  %v990_v22 = vld [vmem:[%s2056_s3 + $0x8] sm:$0xff]  ;;  %v1286_v47 = vld [vmem:[%s2059_s0 + $0x10] sm:$0xff]  }
   0x4   :  { %v999_v5 = vunpack.c.l.bf16 %v998_v4  ;;  %v1000_v6 = vunpack.c.h.bf16 %v998_v4  ;;  %v1426_v7 = vld [vmem:[%s2057_s1] ss:$0 sm:$0xff]  ;;  %v1285_v25 = vld [vmem:[%s2059_s0 + $0x8] sm:$0xff]   ;;  %v1007_v54 = vunpack.c.l.bf16 %v1286_v47  ;;  %v1008_v55 = vunpack.c.h.bf16 %v1286_v47  ;;  %v1294_v60 = vld [vmem:[%s2059_s0 + $0x50] sm:$0xff]  }
   0x5   :  { %v1292_v9 = vld [vmem:[%s2059_s0 + $0x40] sm:$0xff]   ;;  %v1003_v29 = vunpack.c.l.bf16 %v1285_v25  ;;  %v1004_v30 = vunpack.c.h.bf16 %v1285_v25  ;;  %v1293_v33 = vld [vmem:[%s2059_s0 + $0x48] sm:$0xff]   ;;  %v1039_v63 = vunpack.c.l.bf16 %v1294_v60  ;;  %v1040_v0 = vunpack.c.h.bf16 %v1294_v60 }
   0x6   :  { %445 = vmatpush.bf16.msra.mxu0 %v995_v1  ;;  %1350 = vmatpush.bf16.msra.mxu1 %v995_v1  ;;  %v1031_v10 = vunpack.c.l.bf16 %v1292_v9  ;;  %v1032_v11 = vunpack.c.h.bf16 %v1292_v9  ;;  %v152_v12 = vmul.f32 %v1426_v7, %v999_v5  ;;  %v153_v13 = vmul.f32 %v1426_v7, %v1000_v6  ;;  %v1439_v14 = vld [vmem:[%s2058_s2] ss:$0 sm:$0xff] }
   0x7   :  { %1351 = vmatpush.bf16.msra.mxu2 %v995_v1  ;;  %1352 = vmatpush.bf16.msra.mxu3 %v995_v1  ;;  %v989_v28 = vld [vmem:[%s2056_s3] sm:$0xff]  ;;  %v1035_v34 = vunpack.c.l.bf16 %v1293_v33  ;;  %v1036_v35 = vunpack.c.h.bf16 %v1293_v33  ;;  %v154_v36 = vmul.f32 %v1426_v7, %v1003_v29  ;;  %v155_v37 = vmul.f32 %v1426_v7, %v1004_v30 }
   0x8   :  { %v168_v15 = vmul.f32 %v1426_v7, %v1031_v10  ;;  %v169_v16 = vmul.f32 %v1426_v7, %v1032_v11  ;;  %v220_v18 = vadd.f32 %v1439_v14, %v152_v12  ;;  %v221_v19 = vadd.f32 %v1439_v14, %v153_v13  ;;  %v1300_v46 = vld [vmem:[%s2059_s0 + $0x80] sm:$0xff]   ;;  %v1301_v13 = vld [vmem:[%s2059_s0 + $0x88] sm:$0xff]  }
   0x9   :  { %v170_v38 = vmul.f32 %v1426_v7, %v1035_v34  ;;  %v171_v39 = vmul.f32 %v1426_v7, %v1036_v35  ;;  %v222_v40 = vadd.f32 %v1439_v14, %v154_v36  ;;  %v223_v41 = vadd.f32 %v1439_v14, %v155_v37  ;;  %v1308_v47 = vld [vmem:[%s2059_s0 + $0xc0] sm:$0xff]  }
   0xa   :  { %446 = vmatpush.bf16.msra.mxu0 %v994_v2  ;;  %1353 = vmatpush.bf16.msra.mxu1 %v994_v2  ;;  %v236_v20 = vadd.f32 %v1439_v14, %v168_v15  ;;  %v237_v21 = vadd.f32 %v1439_v14, %v169_v16  ;;  %v284_v23 = vmax.f32 %v220_v18, 0.0  ;;  %v285_v24 = vmax.f32 %v221_v19, 0.0  ;;  %v1287_v15 = vld [vmem:[%s2059_s0 + $0x18] sm:$0xff]  }
   0xb   :  { %1354 = vmatpush.bf16.msra.mxu2 %v994_v2  ;;  %1355 = vmatpush.bf16.msra.mxu3 %v994_v2  ;;  %v238_v42 = vadd.f32 %v1439_v14, %v170_v38  ;;  %v239_v43 = vadd.f32 %v1439_v14, %v171_v39  ;;  %v286_v44 = vmax.f32 %v222_v40, 0.0  ;;  %v287_v45 = vmax.f32 %v223_v41, 0.0 }
   0xc   :  { %v300_v26 = vmax.f32 %v236_v20, 0.0  ;;  %v301_v27 = vmax.f32 %v237_v21, 0.0  ;;  %v348_v31 = vpack.c.bf16 %v285_v24, %v284_v23  ;;  %v1063_v50 = vunpack.c.l.bf16 %v1300_v46 }
   0xd   :  { %v302_v48 = vmax.f32 %v238_v42, 0.0  ;;  %v303_v49 = vmax.f32 %v239_v43, 0.0  ;;  %v1064_v51 = vunpack.c.h.bf16 %v1300_v46  ;;  %v349_v56 = vpack.c.bf16 %v287_v45, %v286_v44  ;;  %v1302_v46 = vld [vmem:[%s2059_s0 + $0x90] sm:$0xff]  }
   0xe   :  { %447 = vmatpush.bf16.msra.mxu0 %v993_v3  ;;  %1356 = vmatpush.bf16.msra.mxu1 %v993_v3  ;;  %v356_v32 = vpack.c.bf16 %v301_v27, %v300_v26  ;;  %v184_v52 = vmul.f32 %v1426_v7, %v1063_v50  ;;  %v156_v1 = vmul.f32 %v1426_v7, %v1007_v54  ;;  %v1067_v18 = vunpack.c.l.bf16 %v1301_v13 }
   0xf   :  { %1357 = vmatpush.bf16.msra.mxu2 %v993_v3  ;;  %1358 = vmatpush.bf16.msra.mxu3 %v993_v3  ;;  %v185_v53 = vmul.f32 %v1426_v7, %v1064_v51  ;;  %v357_v57 = vpack.c.bf16 %v303_v49, %v302_v48  ;;  %v157_v2 = vmul.f32 %v1426_v7, %v1008_v55  ;;  %v1068_v19 = vunpack.c.h.bf16 %v1301_v13  ;;  %v1288_v48 = vld [vmem:[%s2059_s0 + $0x20] sm:$0xff]  }
  0x10   :  { %v252_v58 = vadd.f32 %v1439_v14, %v184_v52  ;;  %v172_v4 = vmul.f32 %v1426_v7, %v1039_v63  ;;  %v173_v5 = vmul.f32 %v1426_v7, %v1040_v0  ;;  %v224_v6 = vadd.f32 %v1439_v14, %v156_v1  ;;  %v1296_v1 = vld [vmem:[%s2059_s0 + $0x60] sm:$0xff]  }
  0x11   :  { %v253_v59 = vadd.f32 %v1439_v14, %v185_v53  ;;  %v186_v20 = vmul.f32 %v1426_v7, %v1067_v18  ;;  %v187_v21 = vmul.f32 %v1426_v7, %v1068_v19  ;;  %v1012_v23 = vunpack.c.h.bf16 %v1287_v15 }
  0x12   :  { %448 = vmatpush.bf16.msra.mxu0 %v992_v8  ;;  %1359 = vmatpush.bf16.msra.mxu1 %v992_v8  ;;  %v316_v61 = vmax.f32 %v252_v58, 0.0  ;;  %v240_v9 = vadd.f32 %v1439_v14, %v172_v4  ;;  %v241_v10 = vadd.f32 %v1439_v14, %v173_v5  ;;  %v288_v11 = vmax.f32 %v224_v6, 0.0 }
  0x13   :  { %1360 = vmatpush.bf16.msra.mxu2 %v992_v8  ;;  %1361 = vmatpush.bf16.msra.mxu3 %v992_v8  ;;  %v317_v62 = vmax.f32 %v253_v59, 0.0  ;;  %v225_v8 = vadd.f32 %v1439_v14, %v157_v2  ;;  %v254_v26 = vadd.f32 %v1439_v14, %v186_v20  ;;  %v255_v27 = vadd.f32 %v1439_v14, %v187_v21 }
  0x14   :  { %v304_v16 = vmax.f32 %v240_v9, 0.0  ;;  %v159_v34 = vmul.f32 %v1426_v7, %v1012_v23  ;;  %v1071_v49 = vunpack.c.l.bf16 %v1302_v46  ;;  %v1072_v50 = vunpack.c.h.bf16 %v1302_v46 }
  0x15   :  { %v364_v3 = vpack.c.bf16 %v317_v62, %v316_v61  ;;  %v289_v12 = vmax.f32 %v225_v8, 0.0  ;;  %v318_v29 = vmax.f32 %v254_v26, 0.0  ;;  %v319_v30 = vmax.f32 %v255_v27, 0.0  ;;  %v1289_v26 = vld [vmem:[%s2059_s0 + $0x28] sm:$0xff]  }
  0x16   :  { %449 = vmatpush.bf16.msra.mxu0 %v991_v17  ;;  %1362 = vmatpush.bf16.msra.mxu1 %v991_v17  ;;  %v227_v39 = vadd.f32 %v1439_v14, %v159_v34  ;;  %v1095_v51 = vunpack.c.l.bf16 %v1308_v47  ;;  %v1096_v52 = vunpack.c.h.bf16 %v1308_v47  ;;  %v188_v53 = vmul.f32 %v1426_v7, %v1071_v49 }
  0x17   :  { %1363 = vmatpush.bf16.msra.mxu2 %v991_v17  ;;  %1364 = vmatpush.bf16.msra.mxu3 %v991_v17  ;;  %v305_v17 = vmax.f32 %v241_v10, 0.0  ;;  %v350_v24 = vpack.c.bf16 %v289_v12, %v288_v11  ;;  %v365_v35 = vpack.c.bf16 %v319_v30, %v318_v29  ;;  %v189_v54 = vmul.f32 %v1426_v7, %v1072_v50 }
  0x18   :  { %v291_v43 = vmax.f32 %v227_v39, 0.0  ;;  %v200_v55 = vmul.f32 %v1426_v7, %v1095_v51  ;;  %v1015_v58 = vunpack.c.l.bf16 %v1288_v48  ;;  %v1016_v59 = vunpack.c.h.bf16 %v1288_v48 }
  0x19   :  { %v358_v25 = vpack.c.bf16 %v305_v17, %v304_v16  ;;  %v256_v61 = vadd.f32 %v1439_v14, %v188_v53  ;;  %v257_v62 = vadd.f32 %v1439_v14, %v189_v54  ;;  %v1047_v9 = vunpack.c.l.bf16 %v1296_v1 }
  0x1a   :  { %450 = vmatpush.bf16.msra.mxu0 %v990_v22  ;;  %1365 = vmatpush.bf16.msra.mxu1 %v990_v22  ;;  %v268_v63 = vadd.f32 %v1439_v14, %v200_v55  ;;  %v160_v6 = vmul.f32 %v1426_v7, %v1015_v58  ;;  %v161_v8 = vmul.f32 %v1426_v7, %v1016_v59  ;;  %v1048_v10 = vunpack.c.h.bf16 %v1296_v1  ;;  %v1310_v1 = vld [vmem:[%s2059_s0 + $0xd0] sm:$0xff]  }
  0x1b   :  { %1366 = vmatpush.bf16.msra.mxu2 %v990_v22  ;;  %1367 = vmatpush.bf16.msra.mxu3 %v990_v22  ;;  %v1011_v22 = vunpack.c.l.bf16 %v1287_v15  ;;  %v320_v2 = vmax.f32 %v256_v61, 0.0  ;;  %v176_v13 = vmul.f32 %v1426_v7, %v1047_v9 }
  0x1c   :  { %v332_v4 = vmax.f32 %v268_v63, 0.0  ;;  %v177_v15 = vmul.f32 %v1426_v7, %v1048_v10  ;;  %v228_v16 = vadd.f32 %v1439_v14, %v160_v6  ;;  %v229_v17 = vadd.f32 %v1439_v14, %v161_v8 }
  0x1d   :  { %v158_v33 = vmul.f32 %v1426_v7, %v1011_v22  ;;  %v244_v18 = vadd.f32 %v1439_v14, %v176_v13  ;;  %v1104_v6 = vunpack.c.h.bf16 %v1310_v1 }
  0x1e   :  { %451 = vmatpush.bf16.msra.mxu0 %v989_v28  ;;  %1368 = vmatpush.bf16.msra.mxu1 %v989_v28  ;;  %v245_v19 = vadd.f32 %v1439_v14, %v177_v15  ;;  %v292_v20 = vmax.f32 %v228_v16, 0.0  ;;  %v293_v21 = vmax.f32 %v229_v17, 0.0 }
  0x1f   :  { %1369 = vmatpush.bf16.msra.mxu2 %v989_v28  ;;  %1370 = vmatpush.bf16.msra.mxu3 %v989_v28  ;;  %v1295_v28 = vld [vmem:[%s2059_s0 + $0x58] sm:$0xff]   ;;  %v226_v38 = vadd.f32 %v1439_v14, %v158_v33  ;;  %v308_v22 = vmax.f32 %v244_v18, 0.0 }
  0x20   :  { %v309_v23 = vmax.f32 %v245_v19, 0.0 }
  0x21   :  { %452 = vmatmul.bf16.vlgmr.msra.gmra.mxu0 %v348_v31  ;;  %492 = vmatmul.bf16.vlgmr.msra.gmra.mxu1 %v356_v32  ;;  %v1043_v31 = vunpack.c.l.bf16 %v1295_v28  ;;  %v1044_v32 = vunpack.c.h.bf16 %v1295_v28  ;;  %v290_v42 = vmax.f32 %v226_v38, 0.0 }
  0x22   :  { %532 = vmatmul.bf16.vlgmr.msra.gmra.mxu2 %v364_v3  ;;  %v321_v3 = vmax.f32 %v257_v62, 0.0  ;;  %v360_v38 = vpack.c.bf16 %v309_v23, %v308_v22 }
  0x23   :  { %v174_v36 = vmul.f32 %v1426_v7, %v1043_v31  ;;  %v175_v37 = vmul.f32 %v1426_v7, %v1044_v32 }
  0x24   :  { %v366_v11 = vpack.c.bf16 %v321_v3, %v320_v2  ;;  %v1290_v2 = vld [vmem:[%s2059_s0 + $0x30] sm:$0xff]  }
  0x25   :  { %v242_v40 = vadd.f32 %v1439_v14, %v174_v36  ;;  %v243_v41 = vadd.f32 %v1439_v14, %v175_v37  ;;  %v1019_v36 = vunpack.c.l.bf16 %v1289_v26  ;;  %v1020_v37 = vunpack.c.h.bf16 %v1289_v26 }
  0x26   :  { %v1023_v13 = vunpack.c.l.bf16 %v1290_v2  ;;  %v1024_v15 = vunpack.c.h.bf16 %v1290_v2 }
  0x27   :  { %v306_v44 = vmax.f32 %v242_v40, 0.0  ;;  %v307_v45 = vmax.f32 %v243_v41, 0.0  ;;  %v162_v48 = vmul.f32 %v1426_v7, %v1019_v36  ;;  %v163_v49 = vmul.f32 %v1426_v7, %v1020_v37 }
  0x28   :  { %v164_v26 = vmul.f32 %v1426_v7, %v1023_v13 }
  0x29   :  { %v359_v60 = vpack.c.bf16 %v307_v45, %v306_v44 }
  0x31   :  { %457 = vmatmul.bf16.gmra.mxu0 %v349_v56  ;;  %497 = vmatmul.bf16.gmra.mxu1 %v357_v57  ;;  %v201_v56 = vmul.f32 %v1426_v7, %v1096_v52  ;;  %v351_v57 = vpack.c.bf16 %v291_v43, %v290_v42  ;;  %v1297_v43 = vld [vmem:[%s2059_s0 + $0x68] sm:$0xff]  }
  0x32   :  { %537 = vmatmul.bf16.gmra.mxu2 %v365_v35  ;;  %v352_v35 = vpack.c.bf16 %v293_v21, %v292_v20  ;;  %v1051_v50 = vunpack.c.l.bf16 %v1297_v43  ;;  %v1052_v51 = vunpack.c.h.bf16 %v1297_v43  ;;  %v1298_v21 = vld [vmem:[%s2059_s0 + $0x70] sm:$0xff]   ;;  %v1311_v43 = vld [vmem:[%s2059_s0 + $0xd8] sm:$0xff]  }
  0x33   :  { %v269_v0 = vadd.f32 %v1439_v14, %v201_v56  ;;  %v230_v56 = vadd.f32 %v1439_v14, %v162_v48  ;;  %v1108_v48 = vunpack.c.h.bf16 %v1311_v43 }
  0x34   :  { %v178_v54 = vmul.f32 %v1426_v7, %v1051_v50  ;;  %v179_v55 = vmul.f32 %v1426_v7, %v1052_v51 }
  0x35   :  { %v333_v5 = vmax.f32 %v269_v0, 0.0  ;;  %v1304_v0 = vld [vmem:[%s2059_s0 + $0xa0] sm:$0xff]  }
  0x36   :  { %v246_v58 = vadd.f32 %v1439_v14, %v178_v54  ;;  %v247_v59 = vadd.f32 %v1439_v14, %v179_v55  ;;  %v1079_v3 = vunpack.c.l.bf16 %v1304_v0 }
  0x37   :  { %v372_v12 = vpack.c.bf16 %v333_v5, %v332_v4  ;;  %v1080_v4 = vunpack.c.h.bf16 %v1304_v0  ;;  %v1103_v5 = vunpack.c.l.bf16 %v1310_v1 }
  0x38   :  { %v310_v62 = vmax.f32 %v246_v58, 0.0  ;;  %v311_v63 = vmax.f32 %v247_v59, 0.0  ;;  %v192_v8 = vmul.f32 %v1426_v7, %v1079_v3 }
  0x39   :  { %572 = vmatmul.bf16.vlgmr.msra.gmra.mxu3 %v372_v12  ;;  %v193_v9 = vmul.f32 %v1426_v7, %v1080_v4  ;;  %v204_v10 = vmul.f32 %v1426_v7, %v1103_v5 }
  0x3a   :  { %v361_v16 = vpack.c.bf16 %v311_v63, %v310_v62  ;;  %v260_v17 = vadd.f32 %v1439_v14, %v192_v8 }
  0x3b   :  { %v261_v18 = vadd.f32 %v1439_v14, %v193_v9  ;;  %v272_v19 = vadd.f32 %v1439_v14, %v204_v10 }
  0x3c   :  { %v324_v22 = vmax.f32 %v260_v17, 0.0 }
  0x3d   :  { %v325_v23 = vmax.f32 %v261_v18, 0.0 }
  0x41   :  { %462 = vmatmul.bf16.gmra.mxu0 %v350_v24  ;;  %502 = vmatmul.bf16.gmra.mxu1 %v358_v25  ;;  %v1303_v24 = vld [vmem:[%s2059_s0 + $0x98] sm:$0xff]   ;;  %v1309_v25 = vld [vmem:[%s2059_s0 + $0xc8] sm:$0xff]  }
  0x42   :  { %542 = vmatmul.bf16.gmra.mxu2 %v366_v11  ;;  %v1075_v27 = vunpack.c.l.bf16 %v1303_v24  ;;  %v1076_v28 = vunpack.c.h.bf16 %v1303_v24  ;;  %v1099_v29 = vunpack.c.l.bf16 %v1309_v25  ;;  %v1100_v30 = vunpack.c.h.bf16 %v1309_v25 }
  0x43   :  { %v205_v11 = vmul.f32 %v1426_v7, %v1104_v6  ;;  %v336_v24 = vmax.f32 %v272_v19, 0.0 }
  0x44   :  { %v190_v31 = vmul.f32 %v1426_v7, %v1075_v27  ;;  %v191_v32 = vmul.f32 %v1426_v7, %v1076_v28  ;;  %v202_v33 = vmul.f32 %v1426_v7, %v1099_v29  ;;  %v203_v34 = vmul.f32 %v1426_v7, %v1100_v30 }
  0x45   :  { %v273_v20 = vadd.f32 %v1439_v14, %v205_v11  ;;  %v165_v27 = vmul.f32 %v1426_v7, %v1024_v15  ;;  %v1055_v28 = vunpack.c.l.bf16 %v1298_v21  ;;  %v1056_v29 = vunpack.c.h.bf16 %v1298_v21  ;;  %v1312_v21 = vld [vmem:[%s2059_s0 + $0xe0] sm:$0xff]  }
  0x46   :  { %v258_v39 = vadd.f32 %v1439_v14, %v190_v31  ;;  %v259_v40 = vadd.f32 %v1439_v14, %v191_v32  ;;  %v270_v41 = vadd.f32 %v1439_v14, %v202_v33  ;;  %v271_v42 = vadd.f32 %v1439_v14, %v203_v34 }
  0x47   :  { %v337_v25 = vmax.f32 %v273_v20, 0.0  ;;  %v368_v30 = vpack.c.bf16 %v325_v23, %v324_v22  ;;  %v180_v32 = vmul.f32 %v1426_v7, %v1055_v28  ;;  %v181_v33 = vmul.f32 %v1426_v7, %v1056_v29  ;;  %v1306_v20 = vld [vmem:[%s2059_s0 + $0xb0] sm:$0xff]  }
  0x48   :  { %v322_v44 = vmax.f32 %v258_v39, 0.0  ;;  %v323_v45 = vmax.f32 %v259_v40, 0.0  ;;  %v334_v46 = vmax.f32 %v270_v41, 0.0  ;;  %v335_v47 = vmax.f32 %v271_v42, 0.0  ;;  %v1305_v42 = vld [vmem:[%s2059_s0 + $0xa8] sm:$0xff]  }
  0x49   :  { %v374_v31 = vpack.c.bf16 %v337_v25, %v336_v24  ;;  %v232_v34 = vadd.f32 %v1439_v14, %v164_v26  ;;  %v248_v36 = vadd.f32 %v1439_v14, %v180_v32  ;;  %v249_v37 = vadd.f32 %v1439_v14, %v181_v33 }
  0x4a   :  { %v367_v52 = vpack.c.bf16 %v323_v45, %v322_v44  ;;  %v373_v53 = vpack.c.bf16 %v335_v47, %v334_v46  ;;  %v1291_v44 = vld [vmem:[%s2059_s0 + $0x38] sm:$0xff]   ;;  %v1083_v45 = vunpack.c.l.bf16 %v1305_v42  ;;  %v1084_v46 = vunpack.c.h.bf16 %v1305_v42 }
  0x4b   :  { %v312_v40 = vmax.f32 %v248_v36, 0.0  ;;  %v313_v41 = vmax.f32 %v249_v37, 0.0  ;;  %v1107_v47 = vunpack.c.l.bf16 %v1311_v43  ;;  %v1027_v54 = vunpack.c.l.bf16 %v1291_v44  ;;  %v1307_v42 = vld [vmem:[%s2059_s0 + $0xb8] sm:$0xff]   ;;  %v1313_v43 = vld [vmem:[%s2059_s0 + $0xe8] sm:$0xff]  }
  0x4c   :  { %577 = vmatmul.bf16.gmra.mxu3 %v373_v53  ;;  %v195_v50 = vmul.f32 %v1426_v7, %v1084_v46  ;;  %v1028_v55 = vunpack.c.h.bf16 %v1291_v44  ;;  %v1087_v22 = vunpack.c.l.bf16 %v1306_v20  ;;  %v1088_v23 = vunpack.c.h.bf16 %v1306_v20 }
  0x4d   :  { %v206_v51 = vmul.f32 %v1426_v7, %v1107_v47  ;;  %v166_v2 = vmul.f32 %v1426_v7, %v1027_v54  ;;  %v1111_v24 = vunpack.c.l.bf16 %v1312_v21  ;;  %v1112_v25 = vunpack.c.h.bf16 %v1312_v21 }
  0x4e   :  { %v263_v58 = vadd.f32 %v1439_v14, %v195_v50  ;;  %v167_v3 = vmul.f32 %v1426_v7, %v1028_v55  ;;  %v196_v26 = vmul.f32 %v1426_v7, %v1087_v22  ;;  %v1091_v44 = vunpack.c.l.bf16 %v1307_v42 }
  0x4f   :  { %v274_v59 = vadd.f32 %v1439_v14, %v206_v51  ;;  %v234_v11 = vadd.f32 %v1439_v14, %v166_v2  ;;  %v208_v28 = vmul.f32 %v1426_v7, %v1111_v24  ;;  %v209_v29 = vmul.f32 %v1426_v7, %v1112_v25 }
  0x50   :  { %v327_v63 = vmax.f32 %v263_v58, 0.0  ;;  %v264_v32 = vadd.f32 %v1439_v14, %v196_v26  ;;  %v1115_v46 = vunpack.c.l.bf16 %v1313_v43  ;;  %v1116_v47 = vunpack.c.h.bf16 %v1313_v43 }
  0x51   :  { %467 = vmatmul.bf16.gmra.mxu0 %v351_v57  ;;  %507 = vmatmul.bf16.gmra.mxu1 %v359_v60  ;;  %v231_v57 = vadd.f32 %v1439_v14, %v163_v49  ;;  %v294_v60 = vmax.f32 %v230_v56, 0.0  ;;  %v194_v49 = vmul.f32 %v1426_v7, %v1083_v45  ;;  %v362_v56 = vpack.c.bf16 %v313_v41, %v312_v40 }
  0x52   :  { %547 = vmatmul.bf16.gmra.mxu2 %v367_v52  ;;  %v207_v52 = vmul.f32 %v1426_v7, %v1108_v48  ;;  %v338_v0 = vmax.f32 %v274_v59, 0.0  ;;  %v328_v36 = vmax.f32 %v264_v32, 0.0  ;;  %v1092_v45 = vunpack.c.h.bf16 %v1307_v42  ;;  %v1315_v32 = vld [vmem:[%s2059_s0 + $0xf8] sm:$0xff]  }
  0x53   :  { %v295_v61 = vmax.f32 %v231_v57, 0.0  ;;  %v262_v57 = vadd.f32 %v1439_v14, %v194_v49  ;;  %v198_v48 = vmul.f32 %v1426_v7, %v1091_v44  ;;  %v210_v50 = vmul.f32 %v1426_v7, %v1115_v46 }
  0x54   :  { %v199_v49 = vmul.f32 %v1426_v7, %v1092_v45  ;;  %v211_v51 = vmul.f32 %v1426_v7, %v1116_v47 }
  0x55   :  { %v353_v12 = vpack.c.bf16 %v295_v61, %v294_v60  ;;  %v275_v60 = vadd.f32 %v1439_v14, %v207_v52  ;;  %v1299_v61 = vld [vmem:[%s2059_s0 + $0x78] sm:$0xff]   ;;  %v326_v62 = vmax.f32 %v262_v57, 0.0  ;;  %v266_v52 = vadd.f32 %v1439_v14, %v198_v48 }
  0x56   :  { %v1059_v4 = vunpack.c.l.bf16 %v1299_v61  ;;  %v1060_v5 = vunpack.c.h.bf16 %v1299_v61  ;;  %v278_v54 = vadd.f32 %v1439_v14, %v210_v50  ;;  %v279_v55 = vadd.f32 %v1439_v14, %v211_v51 }
  0x57   :  { %v339_v1 = vmax.f32 %v275_v60, 0.0  ;;  %v369_v6 = vpack.c.bf16 %v327_v63, %v326_v62  ;;  %v330_v58 = vmax.f32 %v266_v52, 0.0 }
  0x58   :  { %v182_v9 = vmul.f32 %v1426_v7, %v1059_v4  ;;  %v183_v10 = vmul.f32 %v1426_v7, %v1060_v5  ;;  %v342_v60 = vmax.f32 %v278_v54, 0.0  ;;  %v343_v61 = vmax.f32 %v279_v55, 0.0 }
  0x59   :  { %v375_v8 = vpack.c.bf16 %v339_v1, %v338_v0 }
  0x5a   :  { %v250_v13 = vadd.f32 %v1439_v14, %v182_v9  ;;  %v251_v15 = vadd.f32 %v1439_v14, %v183_v10  ;;  %v377_v63 = vpack.c.bf16 %v343_v61, %v342_v60 }
  0x5c   :  { %582 = vmatmul.bf16.gmra.mxu3 %v374_v31  ;;  %v314_v18 = vmax.f32 %v250_v13, 0.0  ;;  %v315_v19 = vmax.f32 %v251_v15, 0.0 }
  0x5e   :  { %v363_v31 = vpack.c.bf16 %v315_v19, %v314_v18 }
  0x61   :  { %472 = vmatmul.bf16.gmra.mxu0 %v352_v35  ;;  %512 = vmatmul.bf16.gmra.mxu1 %v360_v38  ;;  %v233_v35 = vadd.f32 %v1439_v14, %v165_v27  ;;  %v296_v38 = vmax.f32 %v232_v34, 0.0  ;;  %v197_v27 = vmul.f32 %v1426_v7, %v1088_v23  ;;  %v276_v34 = vadd.f32 %v1439_v14, %v208_v28 }
  0x62   :  { %552 = vmatmul.bf16.gmra.mxu2 %v368_v30 }
  0x63   :  { %v297_v39 = vmax.f32 %v233_v35, 0.0  ;;  %v265_v33 = vadd.f32 %v1439_v14, %v197_v27  ;;  %v277_v35 = vadd.f32 %v1439_v14, %v209_v29 }
  0x65   :  { %v354_v53 = vpack.c.bf16 %v297_v39, %v296_v38  ;;  %v329_v37 = vmax.f32 %v265_v33, 0.0  ;;  %v340_v38 = vmax.f32 %v276_v34, 0.0  ;;  %v341_v39 = vmax.f32 %v277_v35, 0.0 }
  0x66   :  { %v1123_v34 = vunpack.c.l.bf16 %v1315_v32  ;;  %v1124_v35 = vunpack.c.h.bf16 %v1315_v32 }
  0x67   :  { %v370_v40 = vpack.c.bf16 %v329_v37, %v328_v36  ;;  %v376_v41 = vpack.c.bf16 %v341_v39, %v340_v38 }
  0x68   :  { %v214_v36 = vmul.f32 %v1426_v7, %v1123_v34  ;;  %v215_v37 = vmul.f32 %v1426_v7, %v1124_v35 }
  0x6a   :  { %v282_v38 = vadd.f32 %v1439_v14, %v214_v36  ;;  %v283_v39 = vadd.f32 %v1439_v14, %v215_v37 }
  0x6c   :  { %587 = vmatmul.bf16.gmra.mxu3 %v375_v8  ;;  %v1314_v8 = vld [vmem:[%s2059_s0 + $0xf0] sm:$0xff]   ;;  %v346_v45 = vmax.f32 %v282_v38, 0.0  ;;  %v347_v47 = vmax.f32 %v283_v39, 0.0 }
  0x6d   :  { %v1119_v10 = vunpack.c.l.bf16 %v1314_v8 }
  0x71   :  { %477 = vmatmul.bf16.gmra.mxu0 %v353_v12  ;;  %517 = vmatmul.bf16.gmra.mxu1 %v361_v16  ;;  %v235_v12 = vadd.f32 %v1439_v14, %v167_v3  ;;  %v298_v16 = vmax.f32 %v234_v11, 0.0  ;;  %v1120_v11 = vunpack.c.h.bf16 %v1314_v8 }
  0x72   :  { %557 = vmatmul.bf16.gmra.mxu2 %v369_v6 }
  0x73   :  { %v299_v17 = vmax.f32 %v235_v12, 0.0  ;;  %v212_v12 = vmul.f32 %v1426_v7, %v1119_v10  ;;  %v213_v13 = vmul.f32 %v1426_v7, %v1120_v11  ;;  %v379_v7 = vpack.c.bf16 %v347_v47, %v346_v45 }
  0x75   :  { %v355_v30 = vpack.c.bf16 %v299_v17, %v298_v16  ;;  %v280_v15 = vadd.f32 %v1439_v14, %v212_v12  ;;  %v281_v16 = vadd.f32 %v1439_v14, %v213_v13 }
  0x77   :  { %v344_v21 = vmax.f32 %v280_v15, 0.0  ;;  %v345_v22 = vmax.f32 %v281_v16, 0.0 }
  0x79   :  { %v378_v24 = vpack.c.bf16 %v345_v22, %v344_v21 }
  0x7c   :  { %592 = vmatmul.bf16.gmra.mxu3 %v376_v41 }
  0x81   :  { %482 = vmatmul.bf16.gmra.mxu0 %v354_v53  ;;  %522 = vmatmul.bf16.gmra.mxu1 %v362_v56  ;;  %v267_v53 = vadd.f32 %v1439_v14, %v199_v49 }
  0x82   :  { %562 = vmatmul.bf16.gmra.mxu2 %v370_v40 }
  0x83   :  { %v331_v59 = vmax.f32 %v267_v53, 0.0 }
  0x85   :  { %v371_v62 = vpack.c.bf16 %v331_v59, %v330_v58 }
  0x8c   :  { %597 = vmatmul.bf16.gmra.mxu3 %v377_v63 }
  0x91   :  { %487 = vmatmul.bf16.gmra.mxu0 %v355_v30  ;;  %527 = vmatmul.bf16.gmra.mxu1 %v363_v31 }
  0x92   :  { %567 = vmatmul.bf16.gmra.mxu2 %v371_v62 }
  0x9c   :  { %602 = vmatmul.bf16.gmra.mxu3 %v378_v24 }
  0x9e   :  { %v453_v56 = vpop.f32.mrf.mxu0  ;;  %v1652_v57 = vpop.f32.mrf.mxu1 }
  0x9f   :  { %v811_v0 = vmul.f32 %v453_v56, %v453_v56 }
  0xa5   :  { %v1677_v31 = vpop.f32.mrf.mxu2 }
  0xa6   :  { %v455_v1 = vpop.f32.mrf.mxu0  ;;  %v1654_v2 = vpop.f32.mrf.mxu1 }
  0xa7   :  { %v1128_v3 = vpack.c.bf16 %v455_v1, %v453_v56  ;;  %v741_v4 = vadd.f32 %v455_v1, %v453_v56  ;;  %v812_v5 = vmul.f32 %v455_v1, %v455_v1  ;;  %v1168_v6 = vpack.c.bf16 %v1654_v2, %v1652_v57 }
  0xa9   :  { %1129 = vst [vmem:[%s2060_s4] sm:$0xff] %v1128_v3   ;;  %v875_v9 = vadd.f32 %v812_v5, %v811_v0 }
  0xaa   :  { %1323 = vst [vmem:[%s2060_s4 + $0x40] sm:$0xff] %v1168_v6  }
  0xac   :  { %607 = vmatmul.bf16.gmra.mxu3 %v379_v7 }
  0xad   :  { %v1696_v44 = vpop.f32.mrf.mxu2 }
  0xae   :  { %v458_v17 = vpop.f32.mrf.mxu0  ;;  %v1671_v18 = vpop.f32.mrf.mxu1  ;;  %v1208_v46 = vpack.c.bf16 %v1696_v44, %v1677_v31 }
  0xaf   :  { %v742_v19 = vadd.f32 %v741_v4, %v458_v17  ;;  %v813_v20 = vmul.f32 %v458_v17, %v458_v17 }
  0xb0   :  { %1331 = vst [vmem:[%s2060_s4 + $0x80] sm:$0xff] %v1208_v46  }
  0xb1   :  { %v876_v23 = vadd.f32 %v875_v9, %v813_v20 }
  0xb5   :  { %v1709_v52 = vpop.f32.mrf.mxu2 }
  0xb6   :  { %v460_v25 = vpop.f32.mrf.mxu0  ;;  %v1673_v26 = vpop.f32.mrf.mxu1 }
  0xb7   :  { %v1133_v27 = vpack.c.bf16 %v460_v25, %v458_v17  ;;  %v743_v28 = vadd.f32 %v742_v19, %v460_v25  ;;  %v814_v29 = vmul.f32 %v460_v25, %v460_v25  ;;  %v1173_v30 = vpack.c.bf16 %v1673_v26, %v1671_v18 }
  0xb9   :  { %1316 = vst [vmem:[%s2060_s4 + $0x8] sm:$0xff] %v1133_v27   ;;  %v877_v33 = vadd.f32 %v876_v23, %v814_v29 }
  0xba   :  { %1324 = vst [vmem:[%s2060_s4 + $0x48] sm:$0xff] %v1173_v30  }
  0xbc   :  { %v1732_v63 = vpop.f32.mrf.mxu3 }
  0xbd   :  { %v1719_v55 = vpop.f32.mrf.mxu2 }
  0xbe   :  { %v463_v40 = vpop.f32.mrf.mxu0  ;;  %v1692_v41 = vpop.f32.mrf.mxu1  ;;  %v1213_v56 = vpack.c.bf16 %v1719_v55, %v1709_v52 }
  0xbf   :  { %v1694_v42 = vadd.f32 %v743_v28, %v463_v40  ;;  %v815_v43 = vmul.f32 %v463_v40, %v463_v40 }
  0xc0   :  { %1332 = vst [vmem:[%s2060_s4 + $0x88] sm:$0xff] %v1213_v56  }
  0xc1   :  { %v1700_v48 = vadd.f32 %v877_v33, %v815_v43 }
  0xc4   :  { %v1744_v4 = vpop.f32.mrf.mxu3 }
  0xc5   :  { %v1730_v62 = vpop.f32.mrf.mxu2  ;;  %v1248_v6 = vpack.c.bf16 %v1744_v4, %v1732_v63 }
  0xc6   :  { %v465_v14 = vpop.f32.mrf.mxu0  ;;  %v1705_v49 = vpop.f32.mrf.mxu1 }
  0xc7   :  { %v1138_v50 = vpack.c.bf16 %v465_v14, %v463_v40  ;;  %v1178_v51 = vpack.c.bf16 %v1705_v49, %v1692_v41  ;;  %1339 = vst [vmem:[%s2060_s4 + $0xc0] sm:$0xff] %v1248_v6   ;;  %v816_v34 = vmul.f32 %v465_v14, %v465_v14  ;;  %v745_v38 = vadd.f32 %v1694_v42, %v465_v14 }
  0xc9   :  { %1317 = vst [vmem:[%s2060_s4 + $0x10] sm:$0xff] %v1138_v50   ;;  %v879_v39 = vadd.f32 %v1700_v48, %v816_v34 }
  0xca   :  { %1325 = vst [vmem:[%s2060_s4 + $0x50] sm:$0xff] %v1178_v51  }
  0xcd   :  { %v1742_v3 = vpop.f32.mrf.mxu2 }
  0xce   :  { %v468_v53 = vpop.f32.mrf.mxu0  ;;  %v1717_v54 = vpop.f32.mrf.mxu1  ;;  %v1218_v5 = vpack.c.bf16 %v1742_v3, %v1730_v62 }
  0xcf   :  { %v1762_v13 = vpop.f32.mrf.mxu3  ;;  %v817_v37 = vmul.f32 %v468_v53, %v468_v53  ;;  %v746_v43 = vadd.f32 %v745_v38, %v468_v53 }
  0xd0   :  { %1333 = vst [vmem:[%s2060_s4 + $0x90] sm:$0xff] %v1218_v5  }
  0xd1   :  { %v880_v45 = vadd.f32 %v879_v39, %v817_v37 }
  0xd5   :  { %v1760_v12 = vpop.f32.mrf.mxu2 }
  0xd6   :  { %v470_v58 = vpop.f32.mrf.mxu0  ;;  %v1726_v59 = vpop.f32.mrf.mxu1 }
  0xd7   :  { %v1143_v60 = vpack.c.bf16 %v470_v58, %v468_v53  ;;  %v1183_v61 = vpack.c.bf16 %v1726_v59, %v1717_v54  ;;  %v1774_v19 = vpop.f32.mrf.mxu3  ;;  %v818_v40 = vmul.f32 %v470_v58, %v470_v58  ;;  %v747_v50 = vadd.f32 %v746_v43, %v470_v58 }
  0xd8   :  { %v1253_v21 = vpack.c.bf16 %v1774_v19, %v1762_v13 }
  0xd9   :  { %1318 = vst [vmem:[%s2060_s4 + $0x18] sm:$0xff] %v1143_v60   ;;  %v881_v14 = vadd.f32 %v880_v45, %v818_v40 }
  0xda   :  { %1326 = vst [vmem:[%s2060_s4 + $0x58] sm:$0xff] %v1183_v61  }
  0xdb   :  { %1340 = vst [vmem:[%s2060_s4 + $0xc8] sm:$0xff] %v1253_v21  }
  0xdd   :  { %v1772_v17 = vpop.f32.mrf.mxu2 }
  0xde   :  { %v473_v0 = vpop.f32.mrf.mxu0  ;;  %v1740_v1 = vpop.f32.mrf.mxu1  ;;  %v1223_v20 = vpack.c.bf16 %v1772_v17, %v1760_v12 }
  0xdf   :  { %v1792_v28 = vpop.f32.mrf.mxu3  ;;  %v819_v46 = vmul.f32 %v473_v0, %v473_v0  ;;  %v748_v5 = vadd.f32 %v747_v50, %v473_v0 }
  0xe0   :  { %1334 = vst [vmem:[%s2060_s4 + $0x98] sm:$0xff] %v1223_v20  }
  0xe1   :  { %v882_v48 = vadd.f32 %v881_v14, %v819_v46 }
  0xe5   :  { %v1790_v27 = vpop.f32.mrf.mxu2 }
  0xe6   :  { %v475_v8 = vpop.f32.mrf.mxu0  ;;  %v1756_v9 = vpop.f32.mrf.mxu1 }
  0xe7   :  { %v1148_v10 = vpack.c.bf16 %v475_v8, %v473_v0  ;;  %v1188_v11 = vpack.c.bf16 %v1756_v9, %v1740_v1  ;;  %v1804_v33 = vpop.f32.mrf.mxu3  ;;  %v820_v61 = vmul.f32 %v475_v8, %v475_v8  ;;  %v749_v58 = vadd.f32 %v748_v5, %v475_v8 }
  0xe8   :  { %v1258_v36 = vpack.c.bf16 %v1804_v33, %v1792_v28 }
  0xe9   :  { %1319 = vst [vmem:[%s2060_s4 + $0x20] sm:$0xff] %v1148_v10   ;;  %v883_v6 = vadd.f32 %v882_v48, %v820_v61 }
  0xea   :  { %1327 = vst [vmem:[%s2060_s4 + $0x60] sm:$0xff] %v1188_v11  }
  0xeb   :  { %1341 = vst [vmem:[%s2060_s4 + $0xd0] sm:$0xff] %v1258_v36  }
  0xed   :  { %v1802_v32 = vpop.f32.mrf.mxu2 }
  0xee   :  { %v478_v15 = vpop.f32.mrf.mxu0  ;;  %v1770_v16 = vpop.f32.mrf.mxu1  ;;  %v1228_v35 = vpack.c.bf16 %v1802_v32, %v1790_v27 }
  0xef   :  { %v1824_v42 = vpop.f32.mrf.mxu3  ;;  %v821_v53 = vmul.f32 %v478_v15, %v478_v15  ;;  %v750_v11 = vadd.f32 %v749_v58, %v478_v15 }
  0xf0   :  { %1335 = vst [vmem:[%s2060_s4 + $0xa0] sm:$0xff] %v1228_v35  }
  0xf1   :  { %v884_v20 = vadd.f32 %v883_v6, %v821_v53  ;;  %v828_v6 = vmul.f32 %v1654_v2, %v1654_v2 }
  0xf5   :  { %v1822_v60 = vpop.f32.mrf.mxu2 }
  0xf6   :  { %v480_v22 = vpop.f32.mrf.mxu0  ;;  %v1786_v23 = vpop.f32.mrf.mxu1 }
  0xf7   :  { %v1153_v24 = vpack.c.bf16 %v480_v22, %v478_v15  ;;  %v1193_v25 = vpack.c.bf16 %v1786_v23, %v1770_v16  ;;  %v822_v10 = vmul.f32 %v480_v22, %v480_v22  ;;  %v751_v0 = vadd.f32 %v750_v11, %v480_v22  ;;  %v1836_v35 = vpop.f32.mrf.mxu3 }
  0xf8   :  { %v1263_v8 = vpack.c.bf16 %v1836_v35, %v1824_v42 }
  0xf9   :  { %1320 = vst [vmem:[%s2060_s4 + $0x28] sm:$0xff] %v1153_v24   ;;  %v885_v36 = vadd.f32 %v884_v20, %v822_v10  ;;  %v829_v20 = vmul.f32 %v1671_v18, %v1671_v18 }
  0xfa   :  { %1328 = vst [vmem:[%s2060_s4 + $0x68] sm:$0xff] %v1193_v25  }
  0xfb   :  { %1342 = vst [vmem:[%s2060_s4 + $0xd8] sm:$0xff] %v1263_v8  }
  0xfd   :  { %v1834_v34 = vpop.f32.mrf.mxu2 }
  0xfe   :  { %v483_v29 = vpop.f32.mrf.mxu0  ;;  %v1800_v30 = vpop.f32.mrf.mxu1  ;;  %v1233_v38 = vpack.c.bf16 %v1834_v34, %v1822_v60 }
  0xff   :  { %v823_v21 = vmul.f32 %v483_v29, %v483_v29  ;;  %v752_v39 = vadd.f32 %v751_v0, %v483_v29  ;;  %v1854_v48 = vpop.f32.mrf.mxu3 }
 0x100   :  { %1336 = vst [vmem:[%s2060_s4 + $0xa8] sm:$0xff] %v1233_v38  }
 0x101   :  { %v886_v15 = vadd.f32 %v885_v36, %v823_v21 }
 0x105   :  { %v1852_v5 = vpop.f32.mrf.mxu2 }
 0x106   :  { %v485_v47 = vpop.f32.mrf.mxu0  ;;  %v1818_v7 = vpop.f32.mrf.mxu1 }
 0x107   :  { %v1158_v51 = vpack.c.bf16 %v485_v47, %v483_v29  ;;  %v1198_v56 = vpack.c.bf16 %v1818_v7, %v1800_v30  ;;  %v824_v37 = vmul.f32 %v485_v47, %v485_v47  ;;  %v753_v22 = vadd.f32 %v752_v39, %v485_v47  ;;  %v1876_v38 = vpop.f32.mrf.mxu3 }
 0x108   :  { %v827_v47 = vmul.f32 %v1652_v57, %v1652_v57  ;;  %v1268_v8 = vpack.c.bf16 %v1876_v38, %v1854_v48 }
 0x109   :  { %1321 = vst [vmem:[%s2060_s4 + $0x30] sm:$0xff] %v1158_v51   ;;  %v887_v43 = vadd.f32 %v886_v15, %v824_v37 }
 0x10a   :  { %1329 = vst [vmem:[%s2060_s4 + $0x70] sm:$0xff] %v1198_v56  }
 0x10b   :  { %1343 = vst [vmem:[%s2060_s4 + $0xe0] sm:$0xff] %v1268_v8   ;;  %v840_v8 = vmul.f32 %v1818_v7, %v1818_v7 }
 0x10d   :  { %v1874_v37 = vpop.f32.mrf.mxu2 }
 0x10e   :  { %v488_v24 = vpop.f32.mrf.mxu0  ;;  %v1832_v25 = vpop.f32.mrf.mxu1 }
 0x10f   :  { %v825_v40 = vmul.f32 %v488_v24, %v488_v24  ;;  %v754_v45 = vadd.f32 %v753_v22, %v488_v24 }
 0x111   :  { %v888_v46 = vadd.f32 %v887_v43, %v825_v40  ;;  %v833_v43 = vmul.f32 %v1717_v54, %v1717_v54 }
 0x116   :  { %v490_v50 = vpop.f32.mrf.mxu0  ;;  %v1848_v51 = vpop.f32.mrf.mxu1 }
 0x117   :  { %v1163_v56 = vpack.c.bf16 %v490_v50, %v488_v24  ;;  %v755_v14 = vadd.f32 %v754_v45, %v490_v50  ;;  %v826_v29 = vmul.f32 %v490_v50, %v490_v50  ;;  %v1203_v61 = vpack.c.bf16 %v1848_v51, %v1832_v25 }
 0x119   :  { %1322 = vst [vmem:[%s2060_s4 + $0x38] sm:$0xff] %v1163_v56   ;;  %v756_v53 = vadd.f32 %v755_v14, %v1652_v57  ;;  %v889_v58 = vadd.f32 %v888_v46, %v826_v29  ;;  %v830_v57 = vmul.f32 %v1673_v26, %v1673_v26  ;;  %v834_v46 = vmul.f32 %v1726_v59, %v1726_v59  ;;  %v1900_v14 = vpop.f32.mrf.mxu2 }
 0x11a   :  { %1330 = vst [vmem:[%s2060_s4 + $0x78] sm:$0xff] %v1203_v61   ;;  %v835_v29 = vmul.f32 %v1740_v1, %v1740_v1 }
 0x11b   :  { %v757_v10 = vadd.f32 %v756_v53, %v1654_v2  ;;  %v890_v11 = vadd.f32 %v889_v58, %v827_v47  ;;  %v1238_v2 = vpack.c.bf16 %v1874_v37, %v1852_v5  ;;  %v836_v53 = vmul.f32 %v1756_v9, %v1756_v9 }
 0x11d   :  { %v758_v21 = vadd.f32 %v757_v10, %v1671_v18  ;;  %v891_v24 = vadd.f32 %v890_v11, %v828_v6  ;;  %v831_v18 = vmul.f32 %v1692_v41, %v1692_v41  ;;  %1337 = vst [vmem:[%s2060_s4 + $0xb0] sm:$0xff] %v1238_v2   ;;  %v838_v11 = vmul.f32 %v1786_v23, %v1786_v23 }
 0x11f   :  { %v759_v0 = vadd.f32 %v758_v21, %v1673_v26  ;;  %v892_v36 = vadd.f32 %v891_v24, %v829_v20  ;;  %v832_v26 = vmul.f32 %v1705_v49, %v1705_v49 }
 0x121   :  { %v760_v39 = vadd.f32 %v759_v0, %v1692_v41  ;;  %v893_v15 = vadd.f32 %v892_v36, %v830_v57 }
 0x123   :  { %v761_v40 = vadd.f32 %v760_v39, %v1705_v49  ;;  %v894_v22 = vadd.f32 %v893_v15, %v831_v18  ;;  %v1902_v49 = vpop.f32.mrf.mxu3 }
 0x125   :  { %v895_v45 = vadd.f32 %v894_v22, %v832_v26  ;;  %v762_v41 = vadd.f32 %v761_v40, %v1717_v54  ;;  %v842_v40 = vmul.f32 %v1848_v51, %v1848_v51 }
 0x127   :  { %v763_v50 = vadd.f32 %v762_v41, %v1726_v59  ;;  %v896_v56 = vadd.f32 %v895_v45, %v833_v43  ;;  %v837_v59 = vmul.f32 %v1770_v16, %v1770_v16  ;;  %v844_v41 = vmul.f32 %v1696_v44, %v1696_v44 }
 0x129   :  { %v764_v61 = vadd.f32 %v763_v50, %v1740_v1  ;;  %v897_v47 = vadd.f32 %v896_v56, %v834_v46  ;;  %v1916_v1 = vpop.f32.mrf.mxu2  ;;  %v845_v50 = vmul.f32 %v1709_v52, %v1709_v52 }
 0x12b   :  { %v765_v54 = vadd.f32 %v764_v61, %v1756_v9  ;;  %v898_v58 = vadd.f32 %v897_v47, %v835_v29  ;;  %v1918_v24 = vpop.f32.mrf.mxu3  ;;  %v1243_v9 = vpack.c.bf16 %v1916_v1, %v1900_v14  ;;  %v846_v29 = vmul.f32 %v1719_v55, %v1719_v55 }
 0x12c   :  { %v1273_v57 = vpack.c.bf16 %v1918_v24, %v1902_v49 }
 0x12d   :  { %v766_v6 = vadd.f32 %v765_v54, %v1770_v16  ;;  %v899_v10 = vadd.f32 %v898_v58, %v836_v53  ;;  %v839_v16 = vmul.f32 %v1800_v30, %v1800_v30  ;;  %1338 = vst [vmem:[%s2060_s4 + $0xb8] sm:$0xff] %v1243_v9  }
 0x12e   :  { %1344 = vst [vmem:[%s2060_s4 + $0xe8] sm:$0xff] %v1273_v57   ;;  %v851_v57 = vmul.f32 %v1790_v27, %v1790_v27 }
 0x12f   :  { %v767_v20 = vadd.f32 %v766_v6, %v1786_v23  ;;  %v900_v21 = vadd.f32 %v899_v10, %v837_v59  ;;  %v849_v6 = vmul.f32 %v1760_v12, %v1760_v12 }
 0x131   :  { %v768_v0 = vadd.f32 %v767_v20, %v1800_v30  ;;  %v901_v36 = vadd.f32 %v900_v21, %v838_v11  ;;  %v841_v30 = vmul.f32 %v1832_v25, %v1832_v25 }
 0x133   :  { %v902_v23 = vadd.f32 %v901_v36, %v839_v16  ;;  %v769_v2 = vadd.f32 %v768_v0, %v1818_v7  ;;  %v1942_v22 = vpop.f32.mrf.mxu3  ;;  %v843_v7 = vmul.f32 %v1677_v31, %v1677_v31  ;;  %v852_v16 = vmul.f32 %v1802_v32, %v1802_v32 }
 0x135   :  { %v903_v18 = vadd.f32 %v902_v23, %v840_v8  ;;  %v770_v39 = vadd.f32 %v769_v2, %v1832_v25  ;;  %v853_v23 = vmul.f32 %v1822_v60, %v1822_v60 }
 0x137   :  { %v904_v15 = vadd.f32 %v903_v18, %v841_v30  ;;  %v771_v26 = vadd.f32 %v770_v39, %v1848_v51  ;;  %v854_v18 = vmul.f32 %v1834_v34, %v1834_v34 }
 0x139   :  { %v772_v43 = vadd.f32 %v771_v26, %v1677_v31  ;;  %v905_v45 = vadd.f32 %v904_v15, %v842_v40 }
 0x13b   :  { %v773_v46 = vadd.f32 %v772_v43, %v1696_v44  ;;  %v906_v25 = vadd.f32 %v905_v45, %v843_v7  ;;  %v1956_v31 = vpop.f32.mrf.mxu3  ;;  %v847_v44 = vmul.f32 %v1730_v62, %v1730_v62  ;;  %v857_v45 = vmul.f32 %v1900_v14, %v1900_v14 }
 0x13c   :  { %v1278_v53 = vpack.c.bf16 %v1956_v31, %v1942_v22 }
 0x13d   :  { %v774_v56 = vadd.f32 %v773_v46, %v1709_v52  ;;  %v907_v51 = vadd.f32 %v906_v25, %v844_v41  ;;  %v848_v52 = vmul.f32 %v1742_v3, %v1742_v3  ;;  %v859_v25 = vmul.f32 %v1732_v63, %v1732_v63 }
 0x13e   :  { %1345 = vst [vmem:[%s2060_s4 + $0xf0] sm:$0xff] %v1278_v53  }
 0x13f   :  { %v775_v61 = vadd.f32 %v774_v56, %v1719_v55  ;;  %v908_v47 = vadd.f32 %v907_v51, %v845_v50 }
 0x141   :  { %v776_v54 = vadd.f32 %v775_v61, %v1730_v62  ;;  %v909_v58 = vadd.f32 %v908_v47, %v846_v29  ;;  %v850_v62 = vmul.f32 %v1772_v17, %v1772_v17 }
 0x143   :  { %v777_v55 = vadd.f32 %v776_v54, %v1742_v3  ;;  %v910_v59 = vadd.f32 %v909_v58, %v847_v44  ;;  %v1975_v9 = vpop.f32.mrf.mxu3 }
 0x145   :  { %v911_v10 = vadd.f32 %v910_v59, %v848_v52  ;;  %v778_v11 = vadd.f32 %v777_v55, %v1760_v12 }
 0x147   :  { %v779_v20 = vadd.f32 %v778_v11, %v1772_v17  ;;  %v912_v21 = vadd.f32 %v911_v10, %v849_v6 }
 0x149   :  { %v780_v3 = vadd.f32 %v779_v20, %v1790_v27  ;;  %v913_v0 = vadd.f32 %v912_v21, %v850_v62 }
 0x14b   :  { %v781_v36 = vadd.f32 %v780_v3, %v1802_v32  ;;  %v914_v12 = vadd.f32 %v913_v0, %v851_v57  ;;  %v610_v27 = vpop.f32.mrf.mxu3  ;;  %v855_v32 = vmul.f32 %v1852_v5, %v1852_v5 }
 0x14c   :  { %v1283_v30 = vpack.c.bf16 %v610_v27, %v1975_v9 }
 0x14d   :  { %v782_v17 = vadd.f32 %v781_v36, %v1822_v60  ;;  %v915_v2 = vadd.f32 %v914_v12, %v852_v16  ;;  %v870_v16 = vmul.f32 %v1918_v24, %v1918_v24 }
 0x14e   :  { %1346 = vst [vmem:[%s2060_s4 + $0xf8] sm:$0xff] %v1283_v30   ;;  %v874_v30 = vmul.f32 %v610_v27, %v610_v27 }
 0x14f   :  { %v783_v8 = vadd.f32 %v782_v17, %v1834_v34  ;;  %v916_v39 = vadd.f32 %v915_v2, %v853_v23  ;;  %v856_v34 = vmul.f32 %v1874_v37, %v1874_v37  ;;  %v871_v23 = vmul.f32 %v1942_v22, %v1942_v22 }
 0x150   :  { %v872_v2 = vmul.f32 %v1956_v31, %v1956_v31 }
 0x151   :  { %v917_v15 = vadd.f32 %v916_v39, %v854_v18  ;;  %v784_v26 = vadd.f32 %v783_v8, %v1852_v5  ;;  %v858_v5 = vmul.f32 %v1916_v1, %v1916_v1  ;;  %v873_v18 = vmul.f32 %v1975_v9, %v1975_v9 }
 0x153   :  { %v918_v60 = vadd.f32 %v917_v15, %v855_v32  ;;  %v785_v40 = vadd.f32 %v784_v26, %v1874_v37  ;;  %v860_v37 = vmul.f32 %v1744_v4, %v1744_v4 }
 0x155   :  { %v919_v7 = vadd.f32 %v918_v60, %v856_v34  ;;  %v786_v43 = vadd.f32 %v785_v40, %v1900_v14  ;;  %v861_v14 = vmul.f32 %v1762_v13, %v1762_v13 }
 0x157   :  { %v920_v41 = vadd.f32 %v919_v7, %v857_v45  ;;  %v787_v46 = vadd.f32 %v786_v43, %v1916_v1  ;;  %v862_v1 = vmul.f32 %v1774_v19, %v1774_v19 }
 0x159   :  { %v788_v50 = vadd.f32 %v787_v46, %v1732_v63  ;;  %v921_v56 = vadd.f32 %v920_v41, %v858_v5  ;;  %v863_v63 = vmul.f32 %v1792_v28, %v1792_v28 }
 0x15b   :  { %v789_v51 = vadd.f32 %v788_v50, %v1744_v4  ;;  %v922_v29 = vadd.f32 %v921_v56, %v859_v25  ;;  %v864_v4 = vmul.f32 %v1804_v33, %v1804_v33 }
 0x15d   :  { %v790_v61 = vadd.f32 %v789_v51, %v1762_v13  ;;  %v923_v47 = vadd.f32 %v922_v29, %v860_v37  ;;  %v865_v13 = vmul.f32 %v1824_v42, %v1824_v42 }
 0x15f   :  { %v791_v53 = vadd.f32 %v790_v61, %v1774_v19  ;;  %v924_v44 = vadd.f32 %v923_v47, %v861_v14  ;;  %v866_v19 = vmul.f32 %v1836_v35, %v1836_v35 }
 0x161   :  { %v792_v54 = vadd.f32 %v791_v53, %v1792_v28  ;;  %v925_v58 = vadd.f32 %v924_v44, %v862_v1  ;;  %v867_v28 = vmul.f32 %v1854_v48, %v1854_v48 }
 0x163   :  { %v793_v52 = vadd.f32 %v792_v54, %v1804_v33  ;;  %v926_v55 = vadd.f32 %v925_v58, %v863_v63  ;;  %v868_v33 = vmul.f32 %v1876_v38, %v1876_v38 }
 0x165   :  { %v927_v59 = vadd.f32 %v926_v55, %v864_v4  ;;  %v794_v6 = vadd.f32 %v793_v52, %v1824_v42  ;;  %v869_v42 = vmul.f32 %v1902_v49, %v1902_v49 }
 0x167   :  { %v795_v10 = vadd.f32 %v794_v6, %v1836_v35  ;;  %v928_v11 = vadd.f32 %v927_v59, %v865_v13 }
 0x169   :  { %v796_v62 = vadd.f32 %v795_v10, %v1854_v48  ;;  %v929_v20 = vadd.f32 %v928_v11, %v866_v19 }
 0x16b   :  { %v797_v21 = vadd.f32 %v796_v62, %v1876_v38  ;;  %v930_v57 = vadd.f32 %v929_v20, %v867_v28 }
 0x16d   :  { %v798_v3 = vadd.f32 %v797_v21, %v1902_v49  ;;  %v931_v0 = vadd.f32 %v930_v57, %v868_v33 }
 0x16f   :  { %v799_v35 = vadd.f32 %v798_v3, %v1918_v24  ;;  %v932_v36 = vadd.f32 %v931_v0, %v869_v42 }
 0x171   :  { %v933_v48 = vadd.f32 %v932_v36, %v870_v16  ;;  %v800_v12 = vadd.f32 %v799_v35, %v1942_v22 }
 0x173   :  { %v934_v38 = vadd.f32 %v933_v48, %v871_v23  ;;  %v801_v17 = vadd.f32 %v800_v12, %v1956_v31 }
 0x175   :  { %v935_v49 = vadd.f32 %v934_v38, %v872_v2  ;;  %v802_v8 = vadd.f32 %v801_v17, %v1975_v9 }
 0x177   :  { %v936_v24 = vadd.f32 %v935_v49, %v873_v18  ;;  %v803_v39 = vadd.f32 %v802_v8, %v610_v27 }
 0x179   :  { %v804_v15 = vrot.slane %v803_v39, 4  ;;  %v937_v26 = vadd.f32 %v936_v24, %v874_v30 }
 0x17b   :  { %v805_v32 = vadd.f32 %v804_v15, %v803_v39  ;;  %v938_v60 = vrot.slane %v937_v26, 4 }
 0x17d   :  { %v806_v22 = vrot.slane %v805_v32, 2  ;;  %v939_v40 = vadd.f32 %v938_v60, %v937_v26 }
 0x17f   :  { %v807_v34 = vadd.f32 %v806_v22, %v805_v32  ;;  %v940_v7 = vrot.slane %v939_v40, 2 }
 0x181   :  { %v808_v43 = vrot.slane %v807_v34, 1  ;;  %v941_v45 = vadd.f32 %v940_v7, %v939_v40 }
 0x183   :  { %v809_v31 = vadd.f32 %v808_v43, %v807_v34  ;;  %v942_v41 = vrot.slane %v941_v45, 1 }
 0x185   :  { %810 = vst [vmem:[%s2061_s5] sm:$0xff] %v809_v31  ;;  %v943_v9 = vadd.f32 %v942_v41, %v941_v45 }
 0x187   :  { %944 = vst [vmem:[%s2062_s6] sm:$0xff] %v943_v9 }

// kernel: a_call__.9
= control target key start
LH: loop header
LB: loop body
LE: loop exit
PB: predicated region body
PF: predicated region fallthrough
CT: control target
= control target key end

     0   :  { %s1788_s0 = inlined_call_operand.vmem [shape: bf16[512,128], index: 0, kind: input, shape index: {}]   ;;  %s1789_s1 = inlined_call_operand.vmem [shape: f32[1,128], index: 1, kind: input, shape index: {}]   ;;  %s1790_s2 = inlined_call_operand.vmem [shape: f32[1,128], index: 2, kind: input, shape index: {}]   ;;  %s1791_s3 = inlined_call_operand.vmem [shape: bf16[512,128], index: 3, kind: input, shape index: {}]   ;;  %s1792_s4 = inlined_call_operand.vmem [shape: f32[1,128], index: 4, kind: input, shape index: {}]   ;;  %s1793_s5 = inlined_call_operand.vmem [shape: f32[1,128], index: 5, kind: input, shape index: {}]   ;;  %s1794_s6 = inlined_call_operand.vmem [shape: f32[512,128], index: 6, kind: output, shape index: {}]  }
   0x1   :  { %v748_v0 = vld [vmem:[%s1788_s0] sm:$0xff]   ;;  %v1003_v12 = vld [vmem:[%s1788_s0 + $0x8] sm:$0xff]   ;;  %v1004_v18 = vld [vmem:[%s1788_s0 + $0x10] sm:$0xff]  }
   0x2   :  { %v1114_v1 = vld [vmem:[%s1789_s1] ss:$0 sm:$0xff]  ;;  %v749_v2 = vunpack.c.l.bf16 %v748_v0  ;;  %v750_v5 = vunpack.c.h.bf16 %v748_v0  ;;  %v1034_v13 = vld [vmem:[%s1791_s3 + $0x8] sm:$0xff]   ;;  %v753_v16 = vunpack.c.l.bf16 %v1003_v12  ;;  %v1035_v19 = vld [vmem:[%s1791_s3 + $0x10] sm:$0xff]   ;;  %v754_v22 = vunpack.c.h.bf16 %v1003_v12 }
   0x3   :  { %v1119_v3 = vld [vmem:[%s1790_s2] ss:$0 sm:$0xff]  ;;  %v881_v17 = vunpack.c.l.bf16 %v1034_v13  ;;  %v882_v23 = vunpack.c.h.bf16 %v1034_v13  ;;  %v757_v30 = vunpack.c.l.bf16 %v1004_v18  ;;  %v885_v31 = vunpack.c.l.bf16 %v1035_v19  ;;  %v1005_v40 = vld [vmem:[%s1788_s0 + $0x18] sm:$0xff]   ;;  %v1007_v12 = vld [vmem:[%s1788_s0 + $0x28] sm:$0xff]  }
   0x4   :  { %v876_v4 = vld [vmem:[%s1791_s3] sm:$0xff]   ;;  %v155_v9 = vmul.f32 %v1114_v1, %v749_v2  ;;  %v156_v11 = vmul.f32 %v1114_v1, %v750_v5  ;;  %v157_v26 = vmul.f32 %v1114_v1, %v753_v16  ;;  %v158_v28 = vmul.f32 %v1114_v1, %v754_v22  ;;  %v1036_v41 = vld [vmem:[%s1791_s3 + $0x18] sm:$0xff]  }
   0x5   :  { %v877_v6 = vunpack.c.l.bf16 %v876_v4  ;;  %v1127_v7 = vld [vmem:[%s1792_s4] ss:$0 sm:$0xff]  ;;  %v878_v8 = vunpack.c.h.bf16 %v876_v4  ;;  %v159_v38 = vmul.f32 %v1114_v1, %v757_v30  ;;  %v758_v45 = vunpack.c.h.bf16 %v1004_v18  ;;  %v1008_v30 = vld [vmem:[%s1788_s0 + $0x30] sm:$0xff]  }
   0x6   :  { %v1133_v10 = vld [vmem:[%s1793_s5] ss:$0 sm:$0xff]  ;;  %v223_v20 = vadd.f32 %v1119_v3, %v155_v9  ;;  %v224_v21 = vadd.f32 %v1119_v3, %v156_v11  ;;  %v421_v27 = vmul.f32 %v1127_v7, %v881_v17  ;;  %v422_v29 = vmul.f32 %v1127_v7, %v882_v23 }
   0x7   :  { %v419_v14 = vmul.f32 %v1127_v7, %v877_v6  ;;  %v420_v15 = vmul.f32 %v1127_v7, %v878_v8  ;;  %v225_v34 = vadd.f32 %v1119_v3, %v157_v26  ;;  %v226_v36 = vadd.f32 %v1119_v3, %v158_v28  ;;  %v1006_v54 = vld [vmem:[%s1788_s0 + $0x20] sm:$0xff]  }
   0x8   :  { %v489_v35 = vadd.f32 %v1133_v10, %v421_v27  ;;  %v490_v37 = vadd.f32 %v1133_v10, %v422_v29  ;;  %v423_v39 = vmul.f32 %v1127_v7, %v885_v31  ;;  %v227_v47 = vadd.f32 %v1119_v3, %v159_v38  ;;  %v1037_v59 = vld [vmem:[%s1791_s3 + $0x20] sm:$0xff]  }
   0x9   :  { %v487_v24 = vadd.f32 %v1133_v10, %v419_v14  ;;  %v488_v25 = vadd.f32 %v1133_v10, %v420_v15  ;;  %v886_v49 = vunpack.c.h.bf16 %v1035_v19  ;;  %v160_v51 = vmul.f32 %v1114_v1, %v758_v45 }
   0xa   :  { %v553_v44 = vadd.f32 %v489_v35, %v225_v34  ;;  %v554_v46 = vadd.f32 %v490_v37, %v226_v36  ;;  %v491_v48 = vadd.f32 %v1133_v10, %v423_v39  ;;  %v761_v52 = vunpack.c.l.bf16 %v1005_v40  ;;  %v1039_v35 = vld [vmem:[%s1791_s3 + $0x30] sm:$0xff]  }
   0xb   :  { %v551_v32 = vadd.f32 %v487_v24, %v223_v20  ;;  %v552_v33 = vadd.f32 %v488_v25, %v224_v21  ;;  %v889_v53 = vunpack.c.l.bf16 %v1036_v41  ;;  %v424_v57 = vmul.f32 %v1127_v7, %v886_v49  ;;  %v1038_v21 = vld [vmem:[%s1791_s3 + $0x28] sm:$0xff]  }
   0xc   :  { %v617_v50 = vmax.f32 %v553_v44, 0.0  ;;  %v618_v55 = vmax.f32 %v554_v46, 0.0  ;;  %v555_v56 = vadd.f32 %v491_v48, %v227_v47  ;;  %v762_v58 = vunpack.c.h.bf16 %v1005_v40  ;;  %v1009_v48 = vld [vmem:[%s1788_s0 + $0x38] sm:$0xff]  }
   0xd   :  { %v615_v42 = vmax.f32 %v551_v32, 0.0  ;;  %v616_v43 = vmax.f32 %v552_v33, 0.0  ;;  %v228_v60 = vadd.f32 %v1119_v3, %v160_v51  ;;  %v161_v61 = vmul.f32 %v1114_v1, %v761_v52 }
   0xe   :  { %681 = vst [vmem:[%s1794_s6 + $0x10] sm:$0xff] %v617_v50  ;;  %v425_v62 = vmul.f32 %v1127_v7, %v889_v53  ;;  %v890_v63 = vunpack.c.h.bf16 %v1036_v41  ;;  %v619_v0 = vmax.f32 %v555_v56, 0.0  ;;  %v492_v2 = vadd.f32 %v1133_v10, %v424_v57  ;;  %v1040_v53 = vld [vmem:[%s1791_s3 + $0x38] sm:$0xff]  }
   0xf   :  { %679 = vst [vmem:[%s1794_s6] sm:$0xff] %v615_v42  ;;  %v162_v4 = vmul.f32 %v1114_v1, %v762_v58  ;;  %v765_v5 = vunpack.c.l.bf16 %v1006_v54  ;;  %v229_v6 = vadd.f32 %v1119_v3, %v161_v61  ;;  %v893_v11 = vunpack.c.l.bf16 %v1037_v59 }
  0x10   :  { %680 = vst [vmem:[%s1794_s6 + $0x8] sm:$0xff] %v616_v43  ;;  %v493_v8 = vadd.f32 %v1133_v10, %v425_v62  ;;  %v426_v9 = vmul.f32 %v1127_v7, %v890_v63  ;;  %v556_v13 = vadd.f32 %v492_v2, %v228_v60  ;;  %v766_v16 = vunpack.c.h.bf16 %v1006_v54 }
  0x11   :  { %682 = vst [vmem:[%s1794_s6 + $0x18] sm:$0xff] %v618_v55  ;;  %v230_v14 = vadd.f32 %v1119_v3, %v162_v4  ;;  %v163_v15 = vmul.f32 %v1114_v1, %v765_v5  ;;  %v427_v19 = vmul.f32 %v1127_v7, %v893_v11  ;;  %v894_v20 = vunpack.c.h.bf16 %v1037_v59  ;;  %v1010_v4 = vld [vmem:[%s1788_s0 + $0x40] sm:$0xff]  }
  0x12   :  { %683 = vst [vmem:[%s1794_s6 + $0x20] sm:$0xff] %v619_v0  ;;  %v557_v17 = vadd.f32 %v493_v8, %v229_v6  ;;  %v494_v18 = vadd.f32 %v1133_v10, %v426_v9  ;;  %v620_v22 = vmax.f32 %v556_v13, 0.0  ;;  %v164_v24 = vmul.f32 %v1114_v1, %v766_v16  ;;  %v1041_v11 = vld [vmem:[%s1791_s3 + $0x40] sm:$0xff]  }
  0x13   :  { %v231_v23 = vadd.f32 %v1119_v3, %v163_v15  ;;  %v769_v25 = vunpack.c.l.bf16 %v1007_v12  ;;  %v495_v28 = vadd.f32 %v1133_v10, %v427_v19  ;;  %v428_v29 = vmul.f32 %v1127_v7, %v894_v20 }
  0x14   :  { %v621_v26 = vmax.f32 %v557_v17, 0.0  ;;  %v558_v27 = vadd.f32 %v494_v18, %v230_v14  ;;  %684 = vst [vmem:[%s1794_s6 + $0x28] sm:$0xff] %v620_v22  ;;  %v232_v31 = vadd.f32 %v1119_v3, %v164_v24  ;;  %v897_v33 = vunpack.c.l.bf16 %v1038_v21  ;;  %v1011_v24 = vld [vmem:[%s1788_s0 + $0x48] sm:$0xff]  }
  0x15   :  { %v165_v32 = vmul.f32 %v1114_v1, %v769_v25  ;;  %v770_v34 = vunpack.c.h.bf16 %v1007_v12  ;;  %v559_v37 = vadd.f32 %v495_v28, %v231_v23  ;;  %v496_v38 = vadd.f32 %v1133_v10, %v428_v29  ;;  %v1042_v29 = vld [vmem:[%s1791_s3 + $0x48] sm:$0xff]  }
  0x16   :  { %685 = vst [vmem:[%s1794_s6 + $0x30] sm:$0xff] %v621_v26  ;;  %v622_v36 = vmax.f32 %v558_v27, 0.0  ;;  %v898_v39 = vunpack.c.h.bf16 %v1038_v21  ;;  %v429_v41 = vmul.f32 %v1127_v7, %v897_v33  ;;  %v773_v43 = vunpack.c.l.bf16 %v1008_v30 }
  0x17   :  { %v233_v40 = vadd.f32 %v1119_v3, %v165_v32  ;;  %v166_v42 = vmul.f32 %v1114_v1, %v770_v34  ;;  %v623_v44 = vmax.f32 %v559_v37, 0.0  ;;  %v560_v45 = vadd.f32 %v496_v38, %v232_v31 }
  0x18   :  { %686 = vst [vmem:[%s1794_s6 + $0x38] sm:$0xff] %v622_v36  ;;  %v430_v46 = vmul.f32 %v1127_v7, %v898_v39  ;;  %v901_v47 = vunpack.c.l.bf16 %v1039_v35  ;;  %v497_v49 = vadd.f32 %v1133_v10, %v429_v41  ;;  %v167_v51 = vmul.f32 %v1114_v1, %v773_v43 }
  0x19   :  { %v234_v50 = vadd.f32 %v1119_v3, %v166_v42  ;;  %v774_v52 = vunpack.c.h.bf16 %v1008_v30  ;;  %687 = vst [vmem:[%s1794_s6 + $0x40] sm:$0xff] %v623_v44  ;;  %v624_v54 = vmax.f32 %v560_v45, 0.0  ;;  %v902_v57 = vunpack.c.h.bf16 %v1039_v35  ;;  %v1012_v42 = vld [vmem:[%s1788_s0 + $0x50] sm:$0xff]  }
  0x1a   :  { %v498_v55 = vadd.f32 %v1133_v10, %v430_v46  ;;  %v431_v56 = vmul.f32 %v1127_v7, %v901_v47  ;;  %v561_v58 = vadd.f32 %v497_v49, %v233_v40  ;;  %v235_v59 = vadd.f32 %v1119_v3, %v167_v51  ;;  %v1043_v51 = vld [vmem:[%s1791_s3 + $0x50] sm:$0xff]  }
  0x1b   :  { %v168_v60 = vmul.f32 %v1114_v1, %v774_v52  ;;  %v777_v61 = vunpack.c.l.bf16 %v1009_v48  ;;  %688 = vst [vmem:[%s1794_s6 + $0x48] sm:$0xff] %v624_v54  ;;  %v432_v0 = vmul.f32 %v1127_v7, %v902_v57  ;;  %v905_v2 = vunpack.c.l.bf16 %v1040_v53 }
  0x1c   :  { %v562_v62 = vadd.f32 %v498_v55, %v234_v50  ;;  %v499_v63 = vadd.f32 %v1133_v10, %v431_v56  ;;  %v625_v5 = vmax.f32 %v561_v58, 0.0  ;;  %v778_v9 = vunpack.c.h.bf16 %v1009_v48 }
  0x1d   :  { %v236_v6 = vadd.f32 %v1119_v3, %v168_v60  ;;  %v169_v8 = vmul.f32 %v1114_v1, %v777_v61  ;;  %v500_v14 = vadd.f32 %v1133_v10, %v432_v0  ;;  %v433_v15 = vmul.f32 %v1127_v7, %v905_v2  ;;  %v1013_v60 = vld [vmem:[%s1788_s0 + $0x58] sm:$0xff]  }
  0x1e   :  { %v626_v12 = vmax.f32 %v562_v62, 0.0  ;;  %v563_v13 = vadd.f32 %v499_v63, %v235_v59  ;;  %689 = vst [vmem:[%s1794_s6 + $0x50] sm:$0xff] %v625_v5  ;;  %v170_v17 = vmul.f32 %v1114_v1, %v778_v9  ;;  %v906_v18 = vunpack.c.h.bf16 %v1040_v53  ;;  %v1044_v2 = vld [vmem:[%s1791_s3 + $0x58] sm:$0xff]  }
  0x1f   :  { %v237_v16 = vadd.f32 %v1119_v3, %v169_v8  ;;  %v781_v19 = vunpack.c.l.bf16 %v1010_v4  ;;  %v564_v21 = vadd.f32 %v500_v14, %v236_v6  ;;  %v501_v22 = vadd.f32 %v1133_v10, %v433_v15 }
  0x20   :  { %690 = vst [vmem:[%s1794_s6 + $0x58] sm:$0xff] %v626_v12  ;;  %v627_v20 = vmax.f32 %v563_v13, 0.0  ;;  %v909_v23 = vunpack.c.l.bf16 %v1041_v11  ;;  %v238_v25 = vadd.f32 %v1119_v3, %v170_v17  ;;  %v434_v26 = vmul.f32 %v1127_v7, %v906_v18  ;;  %v1014_v18 = vld [vmem:[%s1788_s0 + $0x60] sm:$0xff]  }
  0x21   :  { %v171_v27 = vmul.f32 %v1114_v1, %v781_v19  ;;  %v782_v28 = vunpack.c.h.bf16 %v1010_v4  ;;  %v628_v30 = vmax.f32 %v564_v21, 0.0  ;;  %v565_v31 = vadd.f32 %v501_v22, %v237_v16 }
  0x22   :  { %691 = vst [vmem:[%s1794_s6 + $0x60] sm:$0xff] %v627_v20  ;;  %v435_v32 = vmul.f32 %v1127_v7, %v909_v23  ;;  %v910_v33 = vunpack.c.h.bf16 %v1041_v11  ;;  %v502_v34 = vadd.f32 %v1133_v10, %v434_v26  ;;  %v785_v37 = vunpack.c.l.bf16 %v1011_v24  ;;  %v1045_v23 = vld [vmem:[%s1791_s3 + $0x60] sm:$0xff]  }
  0x23   :  { %v239_v35 = vadd.f32 %v1119_v3, %v171_v27  ;;  %v172_v36 = vmul.f32 %v1114_v1, %v782_v28  ;;  %692 = vst [vmem:[%s1794_s6 + $0x68] sm:$0xff] %v628_v30  ;;  %v629_v38 = vmax.f32 %v565_v31, 0.0  ;;  %v913_v41 = vunpack.c.l.bf16 %v1042_v29 }
  0x24   :  { %v503_v39 = vadd.f32 %v1133_v10, %v435_v32  ;;  %v436_v40 = vmul.f32 %v1127_v7, %v910_v33  ;;  %v566_v43 = vadd.f32 %v502_v34, %v238_v25  ;;  %v173_v45 = vmul.f32 %v1114_v1, %v785_v37 }
  0x25   :  { %v240_v44 = vadd.f32 %v1119_v3, %v172_v36  ;;  %v786_v46 = vunpack.c.h.bf16 %v1011_v24  ;;  %693 = vst [vmem:[%s1794_s6 + $0x70] sm:$0xff] %v629_v38  ;;  %v437_v49 = vmul.f32 %v1127_v7, %v913_v41  ;;  %v914_v50 = vunpack.c.h.bf16 %v1042_v29  ;;  %v1015_v36 = vld [vmem:[%s1788_s0 + $0x68] sm:$0xff]  }
  0x26   :  { %v567_v47 = vadd.f32 %v503_v39, %v239_v35  ;;  %v504_v48 = vadd.f32 %v1133_v10, %v436_v40  ;;  %v630_v52 = vmax.f32 %v566_v43, 0.0  ;;  %v241_v53 = vadd.f32 %v1119_v3, %v173_v45  ;;  %v1046_v41 = vld [vmem:[%s1791_s3 + $0x68] sm:$0xff]  }
  0x27   :  { %v174_v54 = vmul.f32 %v1114_v1, %v786_v46  ;;  %v789_v55 = vunpack.c.l.bf16 %v1012_v42  ;;  %v505_v58 = vadd.f32 %v1133_v10, %v437_v49  ;;  %v438_v59 = vmul.f32 %v1127_v7, %v914_v50 }
  0x28   :  { %v631_v56 = vmax.f32 %v567_v47, 0.0  ;;  %v568_v57 = vadd.f32 %v504_v48, %v240_v44  ;;  %694 = vst [vmem:[%s1794_s6 + $0x78] sm:$0xff] %v630_v52  ;;  %v917_v63 = vunpack.c.l.bf16 %v1043_v51  ;;  %v790_v0 = vunpack.c.h.bf16 %v1012_v42 }
  0x29   :  { %v242_v61 = vadd.f32 %v1119_v3, %v174_v54  ;;  %v175_v62 = vmul.f32 %v1114_v1, %v789_v55  ;;  %v569_v5 = vadd.f32 %v505_v58, %v241_v53  ;;  %v506_v6 = vadd.f32 %v1133_v10, %v438_v59  ;;  %v1016_v54 = vld [vmem:[%s1788_s0 + $0x70] sm:$0xff]  }
  0x2a   :  { %695 = vst [vmem:[%s1794_s6 + $0x80] sm:$0xff] %v631_v56  ;;  %v632_v4 = vmax.f32 %v568_v57, 0.0  ;;  %v918_v8 = vunpack.c.h.bf16 %v1043_v51  ;;  %v439_v11 = vmul.f32 %v1127_v7, %v917_v63  ;;  %v176_v12 = vmul.f32 %v1114_v1, %v790_v0  ;;  %v1047_v59 = vld [vmem:[%s1791_s3 + $0x70] sm:$0xff]  }
  0x2b   :  { %v243_v9 = vadd.f32 %v1119_v3, %v175_v62  ;;  %v793_v13 = vunpack.c.l.bf16 %v1013_v60  ;;  %v633_v14 = vmax.f32 %v569_v5, 0.0  ;;  %v570_v15 = vadd.f32 %v506_v6, %v242_v61 }
  0x2c   :  { %696 = vst [vmem:[%s1794_s6 + $0x88] sm:$0xff] %v632_v4  ;;  %v440_v16 = vmul.f32 %v1127_v7, %v918_v8  ;;  %v921_v17 = vunpack.c.l.bf16 %v1044_v2  ;;  %v507_v19 = vadd.f32 %v1133_v10, %v439_v11  ;;  %v244_v20 = vadd.f32 %v1119_v3, %v176_v12  ;;  %v1017_v12 = vld [vmem:[%s1788_s0 + $0x78] sm:$0xff]  }
  0x2d   :  { %v177_v21 = vmul.f32 %v1114_v1, %v793_v13  ;;  %v794_v22 = vunpack.c.h.bf16 %v1013_v60  ;;  %697 = vst [vmem:[%s1794_s6 + $0x90] sm:$0xff] %v633_v14  ;;  %v634_v24 = vmax.f32 %v570_v15, 0.0  ;;  %v922_v27 = vunpack.c.h.bf16 %v1044_v2 }
  0x2e   :  { %v508_v25 = vadd.f32 %v1133_v10, %v440_v16  ;;  %v441_v26 = vmul.f32 %v1127_v7, %v921_v17  ;;  %v571_v28 = vadd.f32 %v507_v19, %v243_v9  ;;  %v797_v31 = vunpack.c.l.bf16 %v1014_v18 }
  0x2f   :  { %v245_v29 = vadd.f32 %v1119_v3, %v177_v21  ;;  %v178_v30 = vmul.f32 %v1114_v1, %v794_v22  ;;  %698 = vst [vmem:[%s1794_s6 + $0x98] sm:$0xff] %v634_v24  ;;  %v442_v34 = vmul.f32 %v1127_v7, %v922_v27  ;;  %v925_v35 = vunpack.c.l.bf16 %v1045_v23  ;;  %v1048_v21 = vld [vmem:[%s1791_s3 + $0x78] sm:$0xff]  }
  0x30   :  { %v572_v32 = vadd.f32 %v508_v25, %v244_v20  ;;  %v509_v33 = vadd.f32 %v1133_v10, %v441_v26  ;;  %v635_v37 = vmax.f32 %v571_v28, 0.0  ;;  %v179_v39 = vmul.f32 %v1114_v1, %v797_v31 }
  0x31   :  { %v246_v38 = vadd.f32 %v1119_v3, %v178_v30  ;;  %v798_v40 = vunpack.c.h.bf16 %v1014_v18  ;;  %v510_v44 = vadd.f32 %v1133_v10, %v442_v34  ;;  %v443_v45 = vmul.f32 %v1127_v7, %v925_v35  ;;  %v1018_v30 = vld [vmem:[%s1788_s0 + $0x80] sm:$0xff]  }
  0x32   :  { %v636_v42 = vmax.f32 %v572_v32, 0.0  ;;  %v573_v43 = vadd.f32 %v509_v33, %v245_v29  ;;  %699 = vst [vmem:[%s1794_s6 + $0xa0] sm:$0xff] %v635_v37  ;;  %v247_v46 = vadd.f32 %v1119_v3, %v179_v39  ;;  %v926_v48 = vunpack.c.h.bf16 %v1045_v23  ;;  %v1049_v35 = vld [vmem:[%s1791_s3 + $0x80] sm:$0xff]  }
  0x33   :  { %v180_v47 = vmul.f32 %v1114_v1, %v798_v40  ;;  %v801_v49 = vunpack.c.l.bf16 %v1015_v36  ;;  %v574_v51 = vadd.f32 %v510_v44, %v246_v38  ;;  %v511_v52 = vadd.f32 %v1133_v10, %v443_v45 }
  0x34   :  { %700 = vst [vmem:[%s1794_s6 + $0xa8] sm:$0xff] %v636_v42  ;;  %v637_v50 = vmax.f32 %v573_v43, 0.0  ;;  %v929_v53 = vunpack.c.l.bf16 %v1046_v41  ;;  %v444_v56 = vmul.f32 %v1127_v7, %v926_v48  ;;  %v802_v58 = vunpack.c.h.bf16 %v1015_v36  ;;  %v1019_v48 = vld [vmem:[%s1788_s0 + $0x88] sm:$0xff]  }
  0x35   :  { %v248_v55 = vadd.f32 %v1119_v3, %v180_v47  ;;  %v181_v57 = vmul.f32 %v1114_v1, %v801_v49  ;;  %v638_v60 = vmax.f32 %v574_v51, 0.0  ;;  %v575_v61 = vadd.f32 %v511_v52, %v247_v46 }
  0x36   :  { %701 = vst [vmem:[%s1794_s6 + $0xb0] sm:$0xff] %v637_v50  ;;  %v445_v62 = vmul.f32 %v1127_v7, %v929_v53  ;;  %v930_v63 = vunpack.c.h.bf16 %v1046_v41  ;;  %v512_v0 = vadd.f32 %v1133_v10, %v444_v56  ;;  %v182_v4 = vmul.f32 %v1114_v1, %v802_v58  ;;  %v1050_v53 = vld [vmem:[%s1791_s3 + $0x88] sm:$0xff]  }
  0x37   :  { %v249_v2 = vadd.f32 %v1119_v3, %v181_v57  ;;  %v805_v5 = vunpack.c.l.bf16 %v1016_v54  ;;  %702 = vst [vmem:[%s1794_s6 + $0xb8] sm:$0xff] %v638_v60  ;;  %v639_v6 = vmax.f32 %v575_v61, 0.0  ;;  %v933_v11 = vunpack.c.l.bf16 %v1047_v59 }
  0x38   :  { %v513_v8 = vadd.f32 %v1133_v10, %v445_v62  ;;  %v446_v9 = vmul.f32 %v1127_v7, %v930_v63  ;;  %v576_v13 = vadd.f32 %v512_v0, %v248_v55  ;;  %v250_v14 = vadd.f32 %v1119_v3, %v182_v4  ;;  %v1020_v4 = vld [vmem:[%s1788_s0 + $0x90] sm:$0xff]  }
  0x39   :  { %v183_v15 = vmul.f32 %v1114_v1, %v805_v5  ;;  %v806_v16 = vunpack.c.h.bf16 %v1016_v54  ;;  %703 = vst [vmem:[%s1794_s6 + $0xc0] sm:$0xff] %v639_v6  ;;  %v447_v19 = vmul.f32 %v1127_v7, %v933_v11  ;;  %v934_v20 = vunpack.c.h.bf16 %v1047_v59  ;;  %v1051_v11 = vld [vmem:[%s1791_s3 + $0x90] sm:$0xff]  }
  0x3a   :  { %v577_v17 = vadd.f32 %v513_v8, %v249_v2  ;;  %v514_v18 = vadd.f32 %v1133_v10, %v446_v9  ;;  %v640_v22 = vmax.f32 %v576_v13, 0.0  ;;  %v809_v25 = vunpack.c.l.bf16 %v1017_v12 }
  0x3b   :  { %v251_v23 = vadd.f32 %v1119_v3, %v183_v15  ;;  %v184_v24 = vmul.f32 %v1114_v1, %v806_v16  ;;  %v515_v28 = vadd.f32 %v1133_v10, %v447_v19  ;;  %v448_v29 = vmul.f32 %v1127_v7, %v934_v20 }
  0x3c   :  { %v641_v26 = vmax.f32 %v577_v17, 0.0  ;;  %v578_v27 = vadd.f32 %v514_v18, %v250_v14  ;;  %704 = vst [vmem:[%s1794_s6 + $0xc8] sm:$0xff] %v640_v22  ;;  %v185_v32 = vmul.f32 %v1114_v1, %v809_v25  ;;  %v937_v33 = vunpack.c.l.bf16 %v1048_v21 }
  0x3d   :  { %v252_v31 = vadd.f32 %v1119_v3, %v184_v24  ;;  %v810_v34 = vunpack.c.h.bf16 %v1017_v12  ;;  %v579_v37 = vadd.f32 %v515_v28, %v251_v23  ;;  %v516_v38 = vadd.f32 %v1133_v10, %v448_v29  ;;  %v1021_v24 = vld [vmem:[%s1788_s0 + $0x98] sm:$0xff]  }
  0x3e   :  { %705 = vst [vmem:[%s1794_s6 + $0xd0] sm:$0xff] %v641_v26  ;;  %v642_v36 = vmax.f32 %v578_v27, 0.0  ;;  %v938_v39 = vunpack.c.h.bf16 %v1048_v21  ;;  %v253_v40 = vadd.f32 %v1119_v3, %v185_v32  ;;  %v449_v41 = vmul.f32 %v1127_v7, %v937_v33  ;;  %v1052_v29 = vld [vmem:[%s1791_s3 + $0x98] sm:$0xff]  }
  0x3f   :  { %v186_v42 = vmul.f32 %v1114_v1, %v810_v34  ;;  %v813_v43 = vunpack.c.l.bf16 %v1018_v30  ;;  %v643_v44 = vmax.f32 %v579_v37, 0.0  ;;  %v580_v45 = vadd.f32 %v516_v38, %v252_v31 }
  0x40   :  { %706 = vst [vmem:[%s1794_s6 + $0xd8] sm:$0xff] %v642_v36  ;;  %v450_v46 = vmul.f32 %v1127_v7, %v938_v39  ;;  %v941_v47 = vunpack.c.l.bf16 %v1049_v35  ;;  %v517_v49 = vadd.f32 %v1133_v10, %v449_v41  ;;  %v814_v52 = vunpack.c.h.bf16 %v1018_v30 }
  0x41   :  { %v254_v50 = vadd.f32 %v1119_v3, %v186_v42  ;;  %v187_v51 = vmul.f32 %v1114_v1, %v813_v43  ;;  %707 = vst [vmem:[%s1794_s6 + $0xe0] sm:$0xff] %v643_v44  ;;  %v644_v54 = vmax.f32 %v580_v45, 0.0  ;;  %v942_v57 = vunpack.c.h.bf16 %v1049_v35  ;;  %v1022_v42 = vld [vmem:[%s1788_s0 + $0xa0] sm:$0xff]  }
  0x42   :  { %v518_v55 = vadd.f32 %v1133_v10, %v450_v46  ;;  %v451_v56 = vmul.f32 %v1127_v7, %v941_v47  ;;  %v581_v58 = vadd.f32 %v517_v49, %v253_v40  ;;  %v188_v60 = vmul.f32 %v1114_v1, %v814_v52 }
  0x43   :  { %v255_v59 = vadd.f32 %v1119_v3, %v187_v51  ;;  %v817_v61 = vunpack.c.l.bf16 %v1019_v48  ;;  %708 = vst [vmem:[%s1794_s6 + $0xe8] sm:$0xff] %v644_v54  ;;  %v452_v0 = vmul.f32 %v1127_v7, %v942_v57  ;;  %v945_v2 = vunpack.c.l.bf16 %v1050_v53  ;;  %v1053_v51 = vld [vmem:[%s1791_s3 + $0xa0] sm:$0xff]  }
  0x44   :  { %v582_v62 = vadd.f32 %v518_v55, %v254_v50  ;;  %v519_v63 = vadd.f32 %v1133_v10, %v451_v56  ;;  %v645_v5 = vmax.f32 %v581_v58, 0.0  ;;  %v256_v6 = vadd.f32 %v1119_v3, %v188_v60  ;;  %v1023_v60 = vld [vmem:[%s1788_s0 + $0xa8] sm:$0xff]  }
  0x45   :  { %v189_v8 = vmul.f32 %v1114_v1, %v817_v61  ;;  %v818_v9 = vunpack.c.h.bf16 %v1019_v48  ;;  %v520_v14 = vadd.f32 %v1133_v10, %v452_v0  ;;  %v453_v15 = vmul.f32 %v1127_v7, %v945_v2  ;;  %v1054_v2 = vld [vmem:[%s1791_s3 + $0xa8] sm:$0xff]  }
  0x46   :  { %v646_v12 = vmax.f32 %v582_v62, 0.0  ;;  %v583_v13 = vadd.f32 %v519_v63, %v255_v59  ;;  %709 = vst [vmem:[%s1794_s6 + $0xf0] sm:$0xff] %v645_v5  ;;  %v946_v18 = vunpack.c.h.bf16 %v1050_v53  ;;  %v821_v19 = vunpack.c.l.bf16 %v1020_v4 }
  0x47   :  { %v257_v16 = vadd.f32 %v1119_v3, %v189_v8  ;;  %v190_v17 = vmul.f32 %v1114_v1, %v818_v9  ;;  %v584_v21 = vadd.f32 %v520_v14, %v256_v6  ;;  %v521_v22 = vadd.f32 %v1133_v10, %v453_v15 }
  0x48   :  { %710 = vst [vmem:[%s1794_s6 + $0xf8] sm:$0xff] %v646_v12  ;;  %v647_v20 = vmax.f32 %v583_v13, 0.0  ;;  %v949_v23 = vunpack.c.l.bf16 %v1051_v11  ;;  %v454_v26 = vmul.f32 %v1127_v7, %v946_v18  ;;  %v191_v27 = vmul.f32 %v1114_v1, %v821_v19  ;;  %v1024_v18 = vld [vmem:[%s1788_s0 + $0xb0] sm:$0xff]  }
  0x49   :  { %v258_v25 = vadd.f32 %v1119_v3, %v190_v17  ;;  %v822_v28 = vunpack.c.h.bf16 %v1020_v4  ;;  %v648_v30 = vmax.f32 %v584_v21, 0.0  ;;  %v585_v31 = vadd.f32 %v521_v22, %v257_v16 }
  0x4a   :  { %711 = vst [vmem:[%s1794_s6 + $0x100] sm:$0xff] %v647_v20  ;;  %v455_v32 = vmul.f32 %v1127_v7, %v949_v23  ;;  %v950_v33 = vunpack.c.h.bf16 %v1051_v11  ;;  %v522_v34 = vadd.f32 %v1133_v10, %v454_v26  ;;  %v259_v35 = vadd.f32 %v1119_v3, %v191_v27  ;;  %v1055_v23 = vld [vmem:[%s1791_s3 + $0xb0] sm:$0xff]  }
  0x4b   :  { %v192_v36 = vmul.f32 %v1114_v1, %v822_v28  ;;  %v825_v37 = vunpack.c.l.bf16 %v1021_v24  ;;  %712 = vst [vmem:[%s1794_s6 + $0x108] sm:$0xff] %v648_v30  ;;  %v649_v38 = vmax.f32 %v585_v31, 0.0  ;;  %v953_v41 = vunpack.c.l.bf16 %v1052_v29 }
  0x4c   :  { %v523_v39 = vadd.f32 %v1133_v10, %v455_v32  ;;  %v456_v40 = vmul.f32 %v1127_v7, %v950_v33  ;;  %v586_v43 = vadd.f32 %v522_v34, %v258_v25  ;;  %v826_v46 = vunpack.c.h.bf16 %v1021_v24 }
  0x4d   :  { %v260_v44 = vadd.f32 %v1119_v3, %v192_v36  ;;  %v193_v45 = vmul.f32 %v1114_v1, %v825_v37  ;;  %713 = vst [vmem:[%s1794_s6 + $0x110] sm:$0xff] %v649_v38  ;;  %v457_v49 = vmul.f32 %v1127_v7, %v953_v41  ;;  %v954_v50 = vunpack.c.h.bf16 %v1052_v29  ;;  %v1025_v36 = vld [vmem:[%s1788_s0 + $0xb8] sm:$0xff]  }
  0x4e   :  { %v587_v47 = vadd.f32 %v523_v39, %v259_v35  ;;  %v524_v48 = vadd.f32 %v1133_v10, %v456_v40  ;;  %v650_v52 = vmax.f32 %v586_v43, 0.0  ;;  %v194_v54 = vmul.f32 %v1114_v1, %v826_v46  ;;  %v1056_v41 = vld [vmem:[%s1791_s3 + $0xb8] sm:$0xff]  }
  0x4f   :  { %v261_v53 = vadd.f32 %v1119_v3, %v193_v45  ;;  %v829_v55 = vunpack.c.l.bf16 %v1022_v42  ;;  %v525_v58 = vadd.f32 %v1133_v10, %v457_v49  ;;  %v458_v59 = vmul.f32 %v1127_v7, %v954_v50 }
  0x50   :  { %v651_v56 = vmax.f32 %v587_v47, 0.0  ;;  %v588_v57 = vadd.f32 %v524_v48, %v260_v44  ;;  %714 = vst [vmem:[%s1794_s6 + $0x118] sm:$0xff] %v650_v52  ;;  %v262_v61 = vadd.f32 %v1119_v3, %v194_v54  ;;  %v957_v63 = vunpack.c.l.bf16 %v1053_v51  ;;  %v1026_v54 = vld [vmem:[%s1788_s0 + $0xc0] sm:$0xff]  }
  0x51   :  { %v195_v62 = vmul.f32 %v1114_v1, %v829_v55  ;;  %v830_v0 = vunpack.c.h.bf16 %v1022_v42  ;;  %v589_v5 = vadd.f32 %v525_v58, %v261_v53  ;;  %v526_v6 = vadd.f32 %v1133_v10, %v458_v59  ;;  %v1057_v59 = vld [vmem:[%s1791_s3 + $0xc0] sm:$0xff]  }
  0x52   :  { %715 = vst [vmem:[%s1794_s6 + $0x120] sm:$0xff] %v651_v56  ;;  %v652_v4 = vmax.f32 %v588_v57, 0.0  ;;  %v958_v8 = vunpack.c.h.bf16 %v1053_v51  ;;  %v459_v11 = vmul.f32 %v1127_v7, %v957_v63  ;;  %v833_v13 = vunpack.c.l.bf16 %v1023_v60 }
  0x53   :  { %v263_v9 = vadd.f32 %v1119_v3, %v195_v62  ;;  %v196_v12 = vmul.f32 %v1114_v1, %v830_v0  ;;  %v653_v14 = vmax.f32 %v589_v5, 0.0  ;;  %v590_v15 = vadd.f32 %v526_v6, %v262_v61 }
  0x54   :  { %716 = vst [vmem:[%s1794_s6 + $0x128] sm:$0xff] %v652_v4  ;;  %v460_v16 = vmul.f32 %v1127_v7, %v958_v8  ;;  %v961_v17 = vunpack.c.l.bf16 %v1054_v2  ;;  %v527_v19 = vadd.f32 %v1133_v10, %v459_v11  ;;  %v197_v21 = vmul.f32 %v1114_v1, %v833_v13 }
  0x55   :  { %v264_v20 = vadd.f32 %v1119_v3, %v196_v12  ;;  %v834_v22 = vunpack.c.h.bf16 %v1023_v60  ;;  %717 = vst [vmem:[%s1794_s6 + $0x130] sm:$0xff] %v653_v14  ;;  %v654_v24 = vmax.f32 %v590_v15, 0.0  ;;  %v962_v27 = vunpack.c.h.bf16 %v1054_v2  ;;  %v1027_v12 = vld [vmem:[%s1788_s0 + $0xc8] sm:$0xff]  }
  0x56   :  { %v528_v25 = vadd.f32 %v1133_v10, %v460_v16  ;;  %v461_v26 = vmul.f32 %v1127_v7, %v961_v17  ;;  %v591_v28 = vadd.f32 %v527_v19, %v263_v9  ;;  %v265_v29 = vadd.f32 %v1119_v3, %v197_v21  ;;  %v1058_v21 = vld [vmem:[%s1791_s3 + $0xc8] sm:$0xff]  }
  0x57   :  { %v198_v30 = vmul.f32 %v1114_v1, %v834_v22  ;;  %v837_v31 = vunpack.c.l.bf16 %v1024_v18  ;;  %718 = vst [vmem:[%s1794_s6 + $0x138] sm:$0xff] %v654_v24  ;;  %v462_v34 = vmul.f32 %v1127_v7, %v962_v27  ;;  %v965_v35 = vunpack.c.l.bf16 %v1055_v23 }
  0x58   :  { %v592_v32 = vadd.f32 %v528_v25, %v264_v20  ;;  %v529_v33 = vadd.f32 %v1133_v10, %v461_v26  ;;  %v655_v37 = vmax.f32 %v591_v28, 0.0  ;;  %v838_v40 = vunpack.c.h.bf16 %v1024_v18 }
  0x59   :  { %v266_v38 = vadd.f32 %v1119_v3, %v198_v30  ;;  %v199_v39 = vmul.f32 %v1114_v1, %v837_v31  ;;  %v530_v44 = vadd.f32 %v1133_v10, %v462_v34  ;;  %v463_v45 = vmul.f32 %v1127_v7, %v965_v35  ;;  %v1028_v30 = vld [vmem:[%s1788_s0 + $0xd0] sm:$0xff]  }
  0x5a   :  { %v656_v42 = vmax.f32 %v592_v32, 0.0  ;;  %v593_v43 = vadd.f32 %v529_v33, %v265_v29  ;;  %719 = vst [vmem:[%s1794_s6 + $0x140] sm:$0xff] %v655_v37  ;;  %v200_v47 = vmul.f32 %v1114_v1, %v838_v40  ;;  %v966_v48 = vunpack.c.h.bf16 %v1055_v23  ;;  %v1059_v35 = vld [vmem:[%s1791_s3 + $0xd0] sm:$0xff]  }
  0x5b   :  { %v267_v46 = vadd.f32 %v1119_v3, %v199_v39  ;;  %v841_v49 = vunpack.c.l.bf16 %v1025_v36  ;;  %v594_v51 = vadd.f32 %v530_v44, %v266_v38  ;;  %v531_v52 = vadd.f32 %v1133_v10, %v463_v45 }
  0x5c   :  { %720 = vst [vmem:[%s1794_s6 + $0x148] sm:$0xff] %v656_v42  ;;  %v657_v50 = vmax.f32 %v593_v43, 0.0  ;;  %v969_v53 = vunpack.c.l.bf16 %v1056_v41  ;;  %v268_v55 = vadd.f32 %v1119_v3, %v200_v47  ;;  %v464_v56 = vmul.f32 %v1127_v7, %v966_v48 }
  0x5d   :  { %v201_v57 = vmul.f32 %v1114_v1, %v841_v49  ;;  %v842_v58 = vunpack.c.h.bf16 %v1025_v36  ;;  %v658_v60 = vmax.f32 %v594_v51, 0.0  ;;  %v595_v61 = vadd.f32 %v531_v52, %v267_v46  ;;  %v1651_v49 = vld [vmem:[%s1790_s2] ss:$0 sm:$0xff] }
  0x5e   :  { %721 = vst [vmem:[%s1794_s6 + $0x150] sm:$0xff] %v657_v50  ;;  %v465_v62 = vmul.f32 %v1127_v7, %v969_v53  ;;  %v970_v63 = vunpack.c.h.bf16 %v1056_v41  ;;  %v532_v0 = vadd.f32 %v1133_v10, %v464_v56  ;;  %v845_v5 = vunpack.c.l.bf16 %v1026_v54 }
  0x5f   :  { %v269_v2 = vadd.f32 %v1119_v3, %v201_v57  ;;  %v202_v4 = vmul.f32 %v1114_v1, %v842_v58  ;;  %722 = vst [vmem:[%s1794_s6 + $0x158] sm:$0xff] %v658_v60  ;;  %v659_v6 = vmax.f32 %v595_v61, 0.0  ;;  %v973_v11 = vunpack.c.l.bf16 %v1057_v59 }
  0x60   :  { %v533_v8 = vadd.f32 %v1133_v10, %v465_v62  ;;  %v466_v9 = vmul.f32 %v1127_v7, %v970_v63  ;;  %v596_v13 = vadd.f32 %v532_v0, %v268_v55  ;;  %v203_v15 = vmul.f32 %v1114_v1, %v845_v5  ;;  %v1670_v55 = vld [vmem:[%s1792_s4] ss:$0 sm:$0xff] }
  0x61   :  { %v270_v14 = vadd.f32 %v1119_v3, %v202_v4  ;;  %v846_v16 = vunpack.c.h.bf16 %v1026_v54  ;;  %723 = vst [vmem:[%s1794_s6 + $0x160] sm:$0xff] %v659_v6  ;;  %v467_v19 = vmul.f32 %v1127_v7, %v973_v11  ;;  %v974_v20 = vunpack.c.h.bf16 %v1057_v59  ;;  %v1030_v4 = vld [vmem:[%s1788_s0 + $0xe0] sm:$0xff]  }
  0x62   :  { %v597_v17 = vadd.f32 %v533_v8, %v269_v2  ;;  %v534_v18 = vadd.f32 %v1133_v10, %v466_v9  ;;  %v660_v22 = vmax.f32 %v596_v13, 0.0  ;;  %v271_v23 = vadd.f32 %v1119_v3, %v203_v15  ;;  %v1061_v11 = vld [vmem:[%s1791_s3 + $0xe0] sm:$0xff]  }
  0x63   :  { %v204_v24 = vmul.f32 %v1114_v1, %v846_v16  ;;  %v849_v25 = vunpack.c.l.bf16 %v1027_v12  ;;  %v535_v28 = vadd.f32 %v1133_v10, %v467_v19  ;;  %v468_v29 = vmul.f32 %v1127_v7, %v974_v20 }
  0x64   :  { %v661_v26 = vmax.f32 %v597_v17, 0.0  ;;  %v598_v27 = vadd.f32 %v534_v18, %v270_v14  ;;  %724 = vst [vmem:[%s1794_s6 + $0x168] sm:$0xff] %v660_v22  ;;  %v977_v33 = vunpack.c.l.bf16 %v1058_v21  ;;  %v850_v34 = vunpack.c.h.bf16 %v1027_v12 }
  0x65   :  { %v272_v31 = vadd.f32 %v1119_v3, %v204_v24  ;;  %v205_v32 = vmul.f32 %v1114_v1, %v849_v25  ;;  %v599_v37 = vadd.f32 %v535_v28, %v271_v23  ;;  %v536_v38 = vadd.f32 %v1133_v10, %v468_v29  ;;  %v1637_v1 = vld [vmem:[%s1789_s1] ss:$0 sm:$0xff]  ;;  %v1031_v24 = vld [vmem:[%s1788_s0 + $0xe8] sm:$0xff]  }
  0x66   :  { %725 = vst [vmem:[%s1794_s6 + $0x170] sm:$0xff] %v661_v26  ;;  %v662_v36 = vmax.f32 %v598_v27, 0.0  ;;  %v978_v39 = vunpack.c.h.bf16 %v1058_v21  ;;  %v469_v41 = vmul.f32 %v1127_v7, %v977_v33  ;;  %v206_v42 = vmul.f32 %v1637_v1, %v850_v34  ;;  %v1062_v29 = vld [vmem:[%s1791_s3 + $0xe8] sm:$0xff]  }
  0x67   :  { %v273_v40 = vadd.f32 %v1119_v3, %v205_v32  ;;  %v853_v43 = vunpack.c.l.bf16 %v1028_v30  ;;  %v663_v44 = vmax.f32 %v599_v37, 0.0  ;;  %v600_v45 = vadd.f32 %v536_v38, %v272_v31  ;;  %v1029_v3 = vld [vmem:[%s1788_s0 + $0xd8] sm:$0xff]  }
  0x68   :  { %726 = vst [vmem:[%s1794_s6 + $0x178] sm:$0xff] %v662_v36  ;;  %v470_v46 = vmul.f32 %v1127_v7, %v978_v39  ;;  %v981_v47 = vunpack.c.l.bf16 %v1059_v35  ;;  %v537_v48 = vadd.f32 %v1133_v10, %v469_v41  ;;  %v274_v50 = vadd.f32 %v1651_v49, %v206_v42  ;;  %v1060_v7 = vld [vmem:[%s1791_s3 + $0xd8] sm:$0xff]   ;;  %v1664_v10 = vld [vmem:[%s1793_s5] ss:$0 sm:$0xff]  ;;  %v1032_v42 = vld [vmem:[%s1788_s0 + $0xf0] sm:$0xff]  }
  0x69   :  { %v207_v51 = vmul.f32 %v1637_v1, %v853_v43  ;;  %v854_v52 = vunpack.c.h.bf16 %v1028_v30  ;;  %727 = vst [vmem:[%s1794_s6 + $0x180] sm:$0xff] %v663_v44  ;;  %v664_v53 = vmax.f32 %v600_v45, 0.0  ;;  %v982_v57 = vunpack.c.h.bf16 %v1059_v35 }
  0x6a   :  { %v538_v54 = vadd.f32 %v1664_v10, %v470_v46  ;;  %v471_v56 = vmul.f32 %v1670_v55, %v981_v47  ;;  %v601_v58 = vadd.f32 %v537_v48, %v273_v40  ;;  %v857_v61 = vunpack.c.l.bf16 %v1029_v3 }
  0x6b   :  { %v275_v59 = vadd.f32 %v1651_v49, %v207_v51  ;;  %v208_v60 = vmul.f32 %v1637_v1, %v854_v52  ;;  %728 = vst [vmem:[%s1794_s6 + $0x188] sm:$0xff] %v664_v53  ;;  %v472_v0 = vmul.f32 %v1670_v55, %v982_v57  ;;  %v985_v2 = vunpack.c.l.bf16 %v1060_v7  ;;  %v1063_v51 = vld [vmem:[%s1791_s3 + $0xf0] sm:$0xff]  }
  0x6c   :  { %v602_v62 = vadd.f32 %v538_v54, %v274_v50  ;;  %v539_v63 = vadd.f32 %v1664_v10, %v471_v56  ;;  %v665_v5 = vmax.f32 %v601_v58, 0.0  ;;  %v209_v8 = vmul.f32 %v1637_v1, %v857_v61 }
  0x6d   :  { %v276_v6 = vadd.f32 %v1651_v49, %v208_v60  ;;  %v858_v9 = vunpack.c.h.bf16 %v1029_v3  ;;  %v540_v14 = vadd.f32 %v1664_v10, %v472_v0  ;;  %v473_v15 = vmul.f32 %v1670_v55, %v985_v2  ;;  %v1033_v60 = vld [vmem:[%s1788_s0 + $0xf8] sm:$0xff]  }
  0x6e   :  { %v666_v12 = vmax.f32 %v602_v62, 0.0  ;;  %v603_v13 = vadd.f32 %v539_v63, %v275_v59  ;;  %729 = vst [vmem:[%s1794_s6 + $0x190] sm:$0xff] %v665_v5  ;;  %v277_v16 = vadd.f32 %v1651_v49, %v209_v8  ;;  %v986_v18 = vunpack.c.h.bf16 %v1060_v7  ;;  %v1064_v2 = vld [vmem:[%s1791_s3 + $0xf8] sm:$0xff]  }
  0x6f   :  { %v210_v17 = vmul.f32 %v1637_v1, %v858_v9  ;;  %v861_v19 = vunpack.c.l.bf16 %v1030_v4  ;;  %v604_v21 = vadd.f32 %v540_v14, %v276_v6  ;;  %v541_v22 = vadd.f32 %v1664_v10, %v473_v15 }
  0x70   :  { %730 = vst [vmem:[%s1794_s6 + $0x198] sm:$0xff] %v666_v12  ;;  %v667_v20 = vmax.f32 %v603_v13, 0.0  ;;  %v989_v23 = vunpack.c.l.bf16 %v1061_v11  ;;  %v474_v26 = vmul.f32 %v1670_v55, %v986_v18  ;;  %v862_v28 = vunpack.c.h.bf16 %v1030_v4 }
  0x71   :  { %v278_v25 = vadd.f32 %v1651_v49, %v210_v17  ;;  %v211_v27 = vmul.f32 %v1637_v1, %v861_v19  ;;  %v668_v30 = vmax.f32 %v604_v21, 0.0  ;;  %v605_v31 = vadd.f32 %v541_v22, %v277_v16 }
  0x72   :  { %731 = vst [vmem:[%s1794_s6 + $0x1a0] sm:$0xff] %v667_v20  ;;  %v475_v32 = vmul.f32 %v1670_v55, %v989_v23  ;;  %v990_v33 = vunpack.c.h.bf16 %v1061_v11  ;;  %v542_v34 = vadd.f32 %v1664_v10, %v474_v26  ;;  %v212_v36 = vmul.f32 %v1637_v1, %v862_v28 }
  0x73   :  { %v279_v35 = vadd.f32 %v1651_v49, %v211_v27  ;;  %v865_v37 = vunpack.c.l.bf16 %v1031_v24  ;;  %732 = vst [vmem:[%s1794_s6 + $0x1a8] sm:$0xff] %v668_v30  ;;  %v669_v38 = vmax.f32 %v605_v31, 0.0  ;;  %v993_v41 = vunpack.c.l.bf16 %v1062_v29 }
  0x74   :  { %v543_v39 = vadd.f32 %v1664_v10, %v475_v32  ;;  %v476_v40 = vmul.f32 %v1670_v55, %v990_v33  ;;  %v606_v43 = vadd.f32 %v542_v34, %v278_v25  ;;  %v280_v44 = vadd.f32 %v1651_v49, %v212_v36 }
  0x75   :  { %v213_v45 = vmul.f32 %v1637_v1, %v865_v37  ;;  %v866_v46 = vunpack.c.h.bf16 %v1031_v24  ;;  %733 = vst [vmem:[%s1794_s6 + $0x1b0] sm:$0xff] %v669_v38  ;;  %v477_v48 = vmul.f32 %v1670_v55, %v993_v41  ;;  %v994_v50 = vunpack.c.h.bf16 %v1062_v29 }
  0x76   :  { %v607_v47 = vadd.f32 %v543_v39, %v279_v35  ;;  %v544_v3 = vadd.f32 %v1664_v10, %v476_v40  ;;  %v670_v52 = vmax.f32 %v606_v43, 0.0  ;;  %v869_v54 = vunpack.c.l.bf16 %v1032_v42 }
  0x77   :  { %v281_v7 = vadd.f32 %v1651_v49, %v213_v45  ;;  %v214_v53 = vmul.f32 %v1637_v1, %v866_v46  ;;  %v545_v58 = vadd.f32 %v1664_v10, %v477_v48  ;;  %v478_v59 = vmul.f32 %v1670_v55, %v994_v50 }
  0x78   :  { %v671_v56 = vmax.f32 %v607_v47, 0.0  ;;  %v608_v57 = vadd.f32 %v544_v3, %v280_v44  ;;  %734 = vst [vmem:[%s1794_s6 + $0x1b8] sm:$0xff] %v670_v52  ;;  %v215_v62 = vmul.f32 %v1637_v1, %v869_v54  ;;  %v997_v63 = vunpack.c.l.bf16 %v1063_v51 }
  0x79   :  { %v282_v61 = vadd.f32 %v1651_v49, %v214_v53  ;;  %v870_v0 = vunpack.c.h.bf16 %v1032_v42  ;;  %v609_v5 = vadd.f32 %v545_v58, %v281_v7  ;;  %v546_v6 = vadd.f32 %v1664_v10, %v478_v59 }
  0x7a   :  { %735 = vst [vmem:[%s1794_s6 + $0x1c0] sm:$0xff] %v671_v56  ;;  %v672_v4 = vmax.f32 %v608_v57, 0.0  ;;  %v998_v8 = vunpack.c.h.bf16 %v1063_v51  ;;  %v283_v9 = vadd.f32 %v1651_v49, %v215_v62  ;;  %v479_v11 = vmul.f32 %v1670_v55, %v997_v63 }
  0x7b   :  { %v216_v12 = vmul.f32 %v1637_v1, %v870_v0  ;;  %v873_v13 = vunpack.c.l.bf16 %v1033_v60  ;;  %v673_v14 = vmax.f32 %v609_v5, 0.0  ;;  %v610_v15 = vadd.f32 %v546_v6, %v282_v61 }
  0x7c   :  { %736 = vst [vmem:[%s1794_s6 + $0x1c8] sm:$0xff] %v672_v4  ;;  %v480_v16 = vmul.f32 %v1670_v55, %v998_v8  ;;  %v1001_v17 = vunpack.c.l.bf16 %v1064_v2  ;;  %v547_v18 = vadd.f32 %v1664_v10, %v479_v11  ;;  %v874_v21 = vunpack.c.h.bf16 %v1033_v60 }
  0x7d   :  { %v284_v19 = vadd.f32 %v1651_v49, %v216_v12  ;;  %v217_v20 = vmul.f32 %v1637_v1, %v873_v13  ;;  %737 = vst [vmem:[%s1794_s6 + $0x1d0] sm:$0xff] %v673_v14  ;;  %v674_v22 = vmax.f32 %v610_v15, 0.0  ;;  %v1002_v25 = vunpack.c.h.bf16 %v1064_v2 }
  0x7e   :  { %v548_v23 = vadd.f32 %v1664_v10, %v480_v16  ;;  %v481_v24 = vmul.f32 %v1670_v55, %v1001_v17  ;;  %v611_v26 = vadd.f32 %v547_v18, %v283_v9  ;;  %v218_v28 = vmul.f32 %v1637_v1, %v874_v21 }
  0x7f   :  { %v285_v27 = vadd.f32 %v1651_v49, %v217_v20  ;;  %738 = vst [vmem:[%s1794_s6 + $0x1d8] sm:$0xff] %v674_v22  ;;  %v482_v31 = vmul.f32 %v1670_v55, %v1002_v25 }
  0x80   :  { %v612_v29 = vadd.f32 %v548_v23, %v284_v19  ;;  %v549_v30 = vadd.f32 %v1664_v10, %v481_v24  ;;  %v675_v32 = vmax.f32 %v611_v26, 0.0  ;;  %v286_v33 = vadd.f32 %v1651_v49, %v218_v28 }
  0x81   :  { %v550_v36 = vadd.f32 %v1664_v10, %v482_v31 }
  0x82   :  { %v676_v34 = vmax.f32 %v612_v29, 0.0  ;;  %v613_v35 = vadd.f32 %v549_v30, %v285_v27  ;;  %739 = vst [vmem:[%s1794_s6 + $0x1e0] sm:$0xff] %v675_v32 }
  0x83   :  { %v614_v37 = vadd.f32 %v550_v36, %v286_v33 }
  0x84   :  { %740 = vst [vmem:[%s1794_s6 + $0x1e8] sm:$0xff] %v676_v34  ;;  %v677_v1 = vmax.f32 %v613_v35, 0.0 }
  0x85   :  { %v678_v55 = vmax.f32 %v614_v37, 0.0 }
  0x86   :  { %741 = vst [vmem:[%s1794_s6 + $0x1f0] sm:$0xff] %v677_v1 }
  0x87   :  { %742 = vst [vmem:[%s1794_s6 + $0x1f8] sm:$0xff] %v678_v55 }

</bundles_post_ra>
